<compile_context>
chip_gen: v7x
topology: tpu7x:2x2x1
jax: 0.10.0
libtpu: 0.0.40
codegen_flags: <defaults>
</compile_context>

<pallas_src>
import math

import jax
import jax.numpy as jnp
from jax import lax
from jax.experimental import pallas as pl
from jax.experimental.pallas import tpu as pltpu

# ----------------------------- config (small) -------------------------------
VOCAB = 64
VOCAB_PAD = 128          # lane-dense padded vocab for the head matmul output
BLOCK_SIZE = 8           # context length T
N_LAYER = 2
N_HEAD = 2
N_EMBD = 32
HEAD_DIM = N_EMBD // N_HEAD
LN_EPS = 1e-5
ATT_SCALE = 1.0 / math.sqrt(HEAD_DIM)
NEG_BIG = -1e30          # finite "-inf" for the causal mask

# packed per-layer vector layout (one row of the `vec` input), width 13*C
_C = N_EMBD
OFF_LN1G, OFF_LN1B = 0 * _C, 1 * _C
OFF_BQKV = 2 * _C                    # 3*C wide
OFF_BO = 5 * _C
OFF_LN2G, OFF_LN2B = 6 * _C, 7 * _C
OFF_BFC = 8 * _C                     # 4*C wide
OFF_BPR = 12 * _C
VEC_W = 13 * _C


# ------------------------------ kernel helpers -------------------------------
def _mm_nt(a, b):
    """a:(M,K) @ b:(N,K)^T -> (M,N) f32, no transpose materialized; bf16 MXU."""
    return lax.dot_general(a.astype(jnp.bfloat16), b, (((1,), (1,)), ((), ())),
                           preferred_element_type=jnp.float32)


def _ln(x, g, b):
    """Row-wise LayerNorm over last dim (eps=1e-5), affine. g,b: (1,C) f32."""
    mean = jnp.mean(x, axis=-1, keepdims=True)
    var = jnp.mean((x - mean) ** 2, axis=-1, keepdims=True)
    return (x - mean) * lax.rsqrt(var + LN_EPS) * g + b


def _erf(x):
    # Abramowitz & Stegun 7.1.26 (max abs err ~1.5e-7); only exp/mul/where,
    # so it lowers everywhere.  Matches torch.nn.GELU()'s exact erf to f32 noise.
    a1, a2, a3, a4, a5 = 0.254829592, -0.284496736, 1.421413741, -1.453152027, 1.061405429
    p = 0.3275911
    ax = jnp.abs(x)
    t = 1.0 / (1.0 + p * ax)
    poly = ((((a5 * t + a4) * t + a3) * t + a2) * t + a1) * t
    y = 1.0 - poly * jnp.exp(-(ax * ax))
    return jnp.where(x >= 0.0, y, -y)


def _gelu_exact(x):
    return 0.5 * x * (1.0 + _erf(x * (1.0 / math.sqrt(2.0))))


# ------------------------------ fused GPT kernel -----------------------------
def _gpt_kernel(idx_ref, tok_ref, pos_ref, vec_ref,
                wqkv_ref, wo_ref, wfc_ref, wpr_ref, headw_ref,
                o_ref):
    """One grid step = BT batch elements; everything stays in VMEM/vregs."""
    T = BLOCK_SIZE
    C = N_EMBD
    M = o_ref.shape[0]                 # BT * T rows
    BT = M // T

    # ---- embedding stem: one-hot gather on the MXU + positional add ----
    ids = idx_ref[...]                                             # (M, 1) int32
    vocab_iota = lax.broadcasted_iota(jnp.int32, (M, VOCAB), 1)
    onehot = jnp.where(ids == vocab_iota, 1.0, 0.0).astype(jnp.bfloat16)
    x = jnp.dot(onehot, tok_ref[...],                              # (M, C) f32
                preferred_element_type=jnp.float32)
    x = (x.reshape(BT, T, C) + pos_ref[...][None]).reshape(M, C)

    # causal mask built once (hoisted out of all loops)
    row = lax.broadcasted_iota(jnp.int32, (T, T), 0)
    col = lax.broadcasted_iota(jnp.int32, (T, T), 1)
    causal = col <= row

    for l in range(N_LAYER):                                       # static unroll
        ln1g = vec_ref[l:l + 1, OFF_LN1G:OFF_LN1G + C]
        ln1b = vec_ref[l:l + 1, OFF_LN1B:OFF_LN1B + C]
        bqkv = vec_ref[l:l + 1, OFF_BQKV:OFF_BQKV + 3 * C]
        bo = vec_ref[l:l + 1, OFF_BO:OFF_BO + C]
        ln2g = vec_ref[l:l + 1, OFF_LN2G:OFF_LN2G + C]
        ln2b = vec_ref[l:l + 1, OFF_LN2B:OFF_LN2B + C]
        bfc = vec_ref[l:l + 1, OFF_BFC:OFF_BFC + 4 * C]
        bpr = vec_ref[l:l + 1, OFF_BPR:OFF_BPR + C]

        # ---------------- causal self-attention sub-block ----------------
        h = _ln(x, ln1g, ln1b)
        qkv = _mm_nt(h, wqkv_ref[l]) + bqkv                        # (M, 3C) f32

        ctx_rows = []
        for b in range(BT):                                        # static unroll
            r0, r1 = b * T, (b + 1) * T                            # 8-aligned rows
            heads = []
            for hh in range(N_HEAD):                               # static unroll
                lo, hi = hh * HEAD_DIM, (hh + 1) * HEAD_DIM
                qh = qkv[r0:r1, lo:hi]
                kh = qkv[r0:r1, C + lo:C + hi]
                vh = qkv[r0:r1, 2 * C + lo:2 * C + hi]
                att = lax.dot_general(qh, kh, (((1,), (1,)), ((), ())),
                                      preferred_element_type=jnp.float32)
                att = att * ATT_SCALE                              # (T, T)
                att = jnp.where(causal, att, NEG_BIG)
                att = att - jnp.max(att, axis=-1, keepdims=True)
                p = jnp.exp(att)
                p = p * pl.reciprocal(jnp.sum(p, axis=-1, keepdims=True),
                                      approx=True)                 # EUP divide
                heads.append(jnp.dot(p, vh, preferred_element_type=jnp.float32))
            ctx_rows.append(jnp.concatenate(heads, axis=1))        # (T, C)
        y = jnp.concatenate(ctx_rows, axis=0)                      # (M, C)

        y = _mm_nt(y, wo_ref[l]) + bo
        x = x + y                                                  # residual
        # -------------------------- MLP sub-block ------------------------
        h = _ln(x, ln2g, ln2b)
        h = _mm_nt(h, wfc_ref[l]) + bfc                            # (M, 4C)
        h = _gelu_exact(h)
        h = _mm_nt(h, wpr_ref[l]) + bpr                            # (M, C)
        x = x + h                                                  # residual

    lnfg = vec_ref[N_LAYER:N_LAYER + 1, 0:C]
    lnfb = vec_ref[N_LAYER:N_LAYER + 1, C:2 * C]
    x = _ln(x, lnfg, lnfb)
    logits = _mm_nt(x, headw_ref[...])                             # (M, 128) lane-dense
    o_ref[...] = logits.astype(o_ref.dtype)


# ------------------------------ parameter init -------------------------------
def init_params(key):
    """Per-layer params mirroring the PyTorch module structure."""
    def nrm(k, shape, std=0.02):
        return std * jax.random.normal(k, shape, dtype=jnp.float32)

    keys = iter(jax.random.split(key, 3 + N_LAYER * 6))
    p = {
        "tok_emb": nrm(next(keys), (VOCAB, N_EMBD)),
        "pos_emb": nrm(next(keys), (1, BLOCK_SIZE, N_EMBD)),
        "lnf_g": jnp.ones((N_EMBD,), jnp.float32),
        "lnf_b": jnp.zeros((N_EMBD,), jnp.float32),
        "head_w": nrm(next(keys), (VOCAB, N_EMBD)),       # head: bias=False
        "blocks": [],
    }
    for _ in range(N_LAYER):
        blk = {
            "ln1_g": jnp.ones((N_EMBD,), jnp.float32),
            "ln1_b": jnp.zeros((N_EMBD,), jnp.float32),
            "wq": nrm(next(keys), (N_EMBD, N_EMBD)), "bq": jnp.zeros((N_EMBD,), jnp.float32),
            "wk": nrm(next(keys), (N_EMBD, N_EMBD)), "bk": jnp.zeros((N_EMBD,), jnp.float32),
            "wv": nrm(next(keys), (N_EMBD, N_EMBD)), "bv": jnp.zeros((N_EMBD,), jnp.float32),
            "wo": nrm(next(keys), (N_EMBD, N_EMBD)), "bo": jnp.zeros((N_EMBD,), jnp.float32),
            "ln2_g": jnp.ones((N_EMBD,), jnp.float32),
            "ln2_b": jnp.zeros((N_EMBD,), jnp.float32),
            "w_fc": nrm(next(keys), (4 * N_EMBD, N_EMBD)),
            "b_fc": jnp.zeros((4 * N_EMBD,), jnp.float32),
            "w_proj": nrm(next(keys), (N_EMBD, 4 * N_EMBD)),
            "b_proj": jnp.zeros((N_EMBD,), jnp.float32),
        }
        p["blocks"].append(blk)
    return p


def pack_params(p):
    """One-time packing: stack layers, fuse QKV, bf16 weights, pack all vectors,
    pad head 64 -> 128 lanes."""
    def stk(name, dtype):
        return jnp.stack([blk[name] for blk in p["blocks"]], axis=0).astype(dtype)

    # one packed (L+1, 13C) f32 array holding every LN gamma/beta and bias
    rows = []
    for blk in p["blocks"]:
        rows.append(jnp.concatenate([
            blk["ln1_g"], blk["ln1_b"],
            blk["bq"], blk["bk"], blk["bv"],
            blk["bo"], blk["ln2_g"], blk["ln2_b"],
            blk["b_fc"], blk["b_proj"]]))
    rows.append(jnp.concatenate([p["lnf_g"], p["lnf_b"],
                                 jnp.zeros((VEC_W - 2 * N_EMBD,), jnp.float32)]))
    vec = jnp.stack(rows, axis=0)                                   # (L+1, 13C) f32

    packed = {
        "idx_dummy": None,  # placeholder key order; idx comes from the caller
        "tok_emb": p["tok_emb"].astype(jnp.bfloat16),               # (V, C) bf16
        "pos_emb": p["pos_emb"][0].astype(jnp.float32),             # (T, C) f32
        "vec": vec,                                                 # (L+1, 13C) f32
        "w_qkv": jnp.stack(                                         # (L, 3C, C) bf16
            [jnp.concatenate([blk["wq"], blk["wk"], blk["wv"]], axis=0)
             for blk in p["blocks"]], axis=0).astype(jnp.bfloat16),
        "w_o": stk("wo", jnp.bfloat16),                             # (L, C, C)
        "w_fc": stk("w_fc", jnp.bfloat16),                          # (L, 4C, C)
        "w_proj": stk("w_proj", jnp.bfloat16),                      # (L, C, 4C)
        # zero-pad vocab 64 -> 128: logits store stays lane-dense (unmasked vst)
        "head_w": jnp.pad(p["head_w"],
                          ((0, VOCAB_PAD - VOCAB), (0, 0))).astype(jnp.bfloat16),
    }
    del packed["idx_dummy"]
    return packed


# --------------------------------- forward ----------------------------------
WEIGHT_NAMES = ["tok_emb", "pos_emb", "vec", "w_qkv", "w_o", "w_fc", "w_proj", "head_w"]


def gpt_forward(idx, packed):
    B, T = idx.shape
    assert T == BLOCK_SIZE

    # rows per grid step: aim for ~256 MXU rows; for this config BT == B (1 step)
    BT = max(1, min(B, 256 // T))
    while B % BT != 0:
        BT -= 1
    num_steps = B // BT
    ROWS = BT * T

    idx_flat = idx.reshape(B * T, 1).astype(jnp.int32)
    weights = [packed[name] for name in WEIGHT_NAMES]

    def full_spec(arr):
        nd = arr.ndim
        # constant block index -> weight stays resident in VMEM across grid steps
        return pl.BlockSpec(arr.shape, lambda s, _nd=nd: (0,) * _nd)

    # CORE_PARALLEL actually splits grid steps across v7x's two TensorCores;
    # with a single step there is nothing to split.
    semantics = (pltpu.CORE_PARALLEL,) if num_steps > 1 else (pltpu.ARBITRARY,)

    logits_pad = pl.pallas_call(
        _gpt_kernel,
        out_shape=jax.ShapeDtypeStruct((B * T, VOCAB_PAD), jnp.float32),
        grid=(num_steps,),
        in_specs=[pl.BlockSpec((ROWS, 1), lambda s: (s, 0))]
                 + [full_spec(w) for w in weights],
        out_specs=pl.BlockSpec((ROWS, VOCAB_PAD), lambda s: (s, 0)),
        compiler_params=pltpu.CompilerParams(
            dimension_semantics=semantics,
            vmem_limit_bytes=32 * 1024 * 1024),   # explicit budget (v7x has 64 MiB)
    )(idx_flat, *weights)

    return logits_pad.reshape(B, T, VOCAB_PAD)[:, :, :VOCAB]        # drop padding


# ----------------------------------- main ------------------------------------
if __name__ == "__main__":
    key = jax.random.PRNGKey(0)
    pkey, ikey = jax.random.split(key)
    params = pack_params(init_params(pkey))

    B, T = 2, BLOCK_SIZE
    idx = jax.random.randint(ikey, (B, T), 0, VOCAB, dtype=jnp.int32)

    logits = jax.jit(gpt_forward)(idx, params)
    jax.block_until_ready(logits)
    assert logits.shape == (B, T, VOCAB)
    assert logits.dtype == jnp.float32
    assert bool(jnp.all(jnp.isfinite(logits)))
    print("KERNEL_OK")
</pallas_src>

<mosaic_0001>
module attributes {stable_mosaic.version = 11 : i64} {
  func.func @_gpt_kernel(%arg0: i32, %arg1: memref<16x1xi32, #tpu.memory_space<vmem>>, %arg2: memref<64x32xbf16, #tpu.memory_space<vmem>>, %arg3: memref<8x32xf32, #tpu.memory_space<vmem>>, %arg4: memref<3x416xf32, #tpu.memory_space<vmem>>, %arg5: memref<2x96x32xbf16, #tpu.memory_space<vmem>>, %arg6: memref<2x32x32xbf16, #tpu.memory_space<vmem>>, %arg7: memref<2x128x32xbf16, #tpu.memory_space<vmem>>, %arg8: memref<2x32x128xbf16, #tpu.memory_space<vmem>>, %arg9: memref<128x32xbf16, #tpu.memory_space<vmem>>, %arg10: memref<16x128xf32, #tpu.memory_space<vmem>>) attributes {dimension_semantics = [#tpu.dimension_semantics<arbitrary>], iteration_bounds = array<i64: 1>, scalar_prefetch = 0 : i64, scratch_operands = 0 : i64, tpu.core_type = #tpu.core_type<tc>, window_params = [{transform_indices = @transform_0, window_bounds = array<i64: 16, 1>}, {pipeline_mode = #tpu.pipeline_mode<synchronous>, transform_indices = @transform_1, window_bounds = array<i64: 64, 32>}, {pipeline_mode = #tpu.pipeline_mode<synchronous>, transform_indices = @transform_2, window_bounds = array<i64: 8, 32>}, {pipeline_mode = #tpu.pipeline_mode<synchronous>, transform_indices = @transform_3, window_bounds = array<i64: 3, 416>}, {pipeline_mode = #tpu.pipeline_mode<synchronous>, transform_indices = @transform_4, window_bounds = array<i64: 2, 96, 32>}, {pipeline_mode = #tpu.pipeline_mode<synchronous>, transform_indices = @transform_5, window_bounds = array<i64: 2, 32, 32>}, {pipeline_mode = #tpu.pipeline_mode<synchronous>, transform_indices = @transform_6, window_bounds = array<i64: 2, 128, 32>}, {pipeline_mode = #tpu.pipeline_mode<synchronous>, transform_indices = @transform_7, window_bounds = array<i64: 2, 32, 128>}, {pipeline_mode = #tpu.pipeline_mode<synchronous>, transform_indices = @transform_8, window_bounds = array<i64: 128, 32>}, {transform_indices = @transform_9, window_bounds = array<i64: 16, 128>}]} {
    %c0 = arith.constant 0 : index
    %c0_0 = arith.constant 0 : index
    %0 = vector.load %arg1[%c0, %c0_0] : memref<16x1xi32, #tpu.memory_space<vmem>>, vector<16x1xi32>
    %1 = tpu.iota {dimensions = array<i32: 1>} : vector<16x64xi32>
    %2 = vector.broadcast %0 : vector<16x1xi32> to vector<16x64xi32>
    %3 = arith.cmpi eq, %2, %1 : vector<16x64xi32>
    %cst = arith.constant 1.000000e+00 : f32
    %cst_1 = arith.constant 0.000000e+00 : f32
    %4 = vector.broadcast %cst : f32 to vector<16x64xf32>
    %5 = vector.broadcast %cst_1 : f32 to vector<16x64xf32>
    %6 = arith.select %3, %4, %5 : vector<16x64xi1>, vector<16x64xf32>
    %7 = arith.truncf %6 : vector<16x64xf32> to vector<16x64xbf16>
    %c0_2 = arith.constant 0 : index
    %c0_3 = arith.constant 0 : index
    %8 = vector.load %arg2[%c0_2, %c0_3] : memref<64x32xbf16, #tpu.memory_space<vmem>>, vector<64x32xbf16>
    %cst_4 = arith.constant dense<0.000000e+00> : vector<16x32xf32>
    %9 = tpu.matmul %7, %8, %cst_4 {dimension_numbers = #tpu.dot_dimension_numbers<[1], [0], [0], [1], [0, 0, 1, 1], [], []>} : vector<16x64xbf16>, vector<64x32xbf16>, vector<16x32xf32> -> vector<16x32xf32>
    %10 = vector.shape_cast %9 : vector<16x32xf32> to vector<2x8x32xf32>
    %c0_5 = arith.constant 0 : index
    %c0_6 = arith.constant 0 : index
    %11 = vector.load %arg3[%c0_5, %c0_6] : memref<8x32xf32, #tpu.memory_space<vmem>>, vector<8x32xf32>
    %12 = vector.shape_cast %11 : vector<8x32xf32> to vector<1x8x32xf32>
    %13 = vector.broadcast %12 : vector<1x8x32xf32> to vector<2x8x32xf32>
    %14 = arith.addf %10, %13 : vector<2x8x32xf32>
    %15 = vector.shape_cast %14 : vector<2x8x32xf32> to vector<16x32xf32>
    %16 = tpu.iota {dimensions = array<i32: 0>} : vector<8x8xi32>
    %17 = tpu.iota {dimensions = array<i32: 1>} : vector<8x8xi32>
    %18 = arith.cmpi sle, %17, %16 : vector<8x8xi32>
    %c0_7 = arith.constant 0 : index
    %c0_8 = arith.constant 0 : index
    %19 = vector.load %arg4[%c0_7, %c0_8] : memref<3x416xf32, #tpu.memory_space<vmem>>, vector<1x32xf32>
    %c0_9 = arith.constant 0 : index
    %c32 = arith.constant 32 : index
    %20 = vector.load %arg4[%c0_9, %c32] : memref<3x416xf32, #tpu.memory_space<vmem>>, vector<1x32xf32>
    %c0_10 = arith.constant 0 : index
    %c64 = arith.constant 64 : index
    %21 = vector.load %arg4[%c0_10, %c64] : memref<3x416xf32, #tpu.memory_space<vmem>>, vector<1x96xf32>
    %c0_11 = arith.constant 0 : index
    %c160 = arith.constant 160 : index
    %22 = vector.load %arg4[%c0_11, %c160] : memref<3x416xf32, #tpu.memory_space<vmem>>, vector<1x32xf32>
    %c0_12 = arith.constant 0 : index
    %c192 = arith.constant 192 : index
    %23 = vector.load %arg4[%c0_12, %c192] : memref<3x416xf32, #tpu.memory_space<vmem>>, vector<1x32xf32>
    %c0_13 = arith.constant 0 : index
    %c224 = arith.constant 224 : index
    %24 = vector.load %arg4[%c0_13, %c224] : memref<3x416xf32, #tpu.memory_space<vmem>>, vector<1x32xf32>
    %c0_14 = arith.constant 0 : index
    %c256 = arith.constant 256 : index
    %25 = vector.load %arg4[%c0_14, %c256] : memref<3x416xf32, #tpu.memory_space<vmem>>, vector<1x128xf32>
    %c0_15 = arith.constant 0 : index
    %c384 = arith.constant 384 : index
    %26 = vector.load %arg4[%c0_15, %c384] : memref<3x416xf32, #tpu.memory_space<vmem>>, vector<1x32xf32>
    %cst_16 = arith.constant dense<0.000000e+00> : vector<16xf32>
    %27 = vector.multi_reduction <add>, %15, %cst_16 [1] : vector<16x32xf32> to vector<16xf32>
    %28 = vector.shape_cast %27 : vector<16xf32> to vector<16x1xf32>
    %cst_17 = arith.constant 3.200000e+01 : f32
    %29 = vector.broadcast %cst_17 : f32 to vector<16x1xf32>
    %30 = arith.divf %28, %29 : vector<16x1xf32>
    %31 = vector.broadcast %30 : vector<16x1xf32> to vector<16x32xf32>
    %32 = arith.subf %15, %31 : vector<16x32xf32>
    %33 = arith.mulf %32, %32 : vector<16x32xf32>
    %cst_18 = arith.constant dense<0.000000e+00> : vector<16xf32>
    %34 = vector.multi_reduction <add>, %33, %cst_18 [1] : vector<16x32xf32> to vector<16xf32>
    %35 = vector.shape_cast %34 : vector<16xf32> to vector<16x1xf32>
    %cst_19 = arith.constant 3.200000e+01 : f32
    %36 = vector.broadcast %cst_19 : f32 to vector<16x1xf32>
    %37 = arith.divf %35, %36 : vector<16x1xf32>
    %38 = vector.broadcast %30 : vector<16x1xf32> to vector<16x32xf32>
    %39 = arith.subf %15, %38 : vector<16x32xf32>
    %cst_20 = arith.constant 9.99999974E-6 : f32
    %40 = vector.broadcast %cst_20 : f32 to vector<16x1xf32>
    %41 = arith.addf %37, %40 : vector<16x1xf32>
    %42 = math.rsqrt %41 : vector<16x1xf32>
    %43 = vector.broadcast %42 : vector<16x1xf32> to vector<16x32xf32>
    %44 = arith.mulf %39, %43 : vector<16x32xf32>
    %45 = vector.broadcast %19 : vector<1x32xf32> to vector<16x32xf32>
    %46 = arith.mulf %44, %45 : vector<16x32xf32>
    %47 = vector.broadcast %20 : vector<1x32xf32> to vector<16x32xf32>
    %48 = arith.addf %46, %47 : vector<16x32xf32>
    %c0_21 = arith.constant 0 : index
    %c0_22 = arith.constant 0 : index
    %c0_23 = arith.constant 0 : index
    %49 = vector.load %arg5[%c0_21, %c0_22, %c0_23] : memref<2x96x32xbf16, #tpu.memory_space<vmem>>, vector<1x96x32xbf16>
    %50 = vector.shape_cast %49 : vector<1x96x32xbf16> to vector<96x32xbf16>
    %51 = arith.truncf %48 : vector<16x32xf32> to vector<16x32xbf16>
    %cst_24 = arith.constant dense<0.000000e+00> : vector<16x96xf32>
    %52 = tpu.matmul %51, %50, %cst_24 {dimension_numbers = #tpu.dot_dimension_numbers<[1], [1], [0], [0], [0, 0, 1, 0], [], []>} : vector<16x32xbf16>, vector<96x32xbf16>, vector<16x96xf32> -> vector<16x96xf32>
    %53 = vector.broadcast %21 : vector<1x96xf32> to vector<16x96xf32>
    %54 = arith.addf %52, %53 : vector<16x96xf32>
    %55 = vector.extract_strided_slice %54 {offsets = [0, 0], sizes = [8, 16], strides = [1, 1]} : vector<16x96xf32> to vector<8x16xf32>
    %56 = vector.extract_strided_slice %54 {offsets = [0, 32], sizes = [8, 16], strides = [1, 1]} : vector<16x96xf32> to vector<8x16xf32>
    %57 = vector.extract_strided_slice %54 {offsets = [0, 64], sizes = [8, 16], strides = [1, 1]} : vector<16x96xf32> to vector<8x16xf32>
    %cst_25 = arith.constant dense<0.000000e+00> : vector<8x8xf32>
    %58 = tpu.matmul %55, %56, %cst_25 {dimension_numbers = #tpu.dot_dimension_numbers<[1], [1], [0], [0], [0, 0, 1, 0], [], []>} : vector<8x16xf32>, vector<8x16xf32>, vector<8x8xf32> -> vector<8x8xf32>
    %cst_26 = arith.constant 2.500000e-01 : f32
    %59 = vector.broadcast %cst_26 : f32 to vector<8x8xf32>
    %60 = arith.mulf %58, %59 : vector<8x8xf32>
    %cst_27 = arith.constant -1.000000e+30 : f32
    %61 = vector.broadcast %cst_27 : f32 to vector<8x8xf32>
    %62 = arith.select %18, %60, %61 : vector<8x8xi1>, vector<8x8xf32>
    %cst_28 = arith.constant dense<0xFF800000> : vector<8xf32>
    %63 = vector.multi_reduction <maximumf>, %62, %cst_28 [1] : vector<8x8xf32> to vector<8xf32>
    %64 = vector.shape_cast %63 : vector<8xf32> to vector<8x1xf32>
    %65 = vector.broadcast %64 : vector<8x1xf32> to vector<8x8xf32>
    %66 = arith.subf %62, %65 : vector<8x8xf32>
    %67 = math.exp %66 : vector<8x8xf32>
    %cst_29 = arith.constant dense<0.000000e+00> : vector<8xf32>
    %68 = vector.multi_reduction <add>, %67, %cst_29 [1] : vector<8x8xf32> to vector<8xf32>
    %69 = vector.shape_cast %68 : vector<8xf32> to vector<8x1xf32>
    %70 = tpu.reciprocal %69 {approx = true} : vector<8x1xf32> -> vector<8x1xf32>
    %71 = vector.broadcast %70 : vector<8x1xf32> to vector<8x8xf32>
    %72 = arith.mulf %67, %71 : vector<8x8xf32>
    %cst_30 = arith.constant dense<0.000000e+00> : vector<8x16xf32>
    %73 = tpu.matmul %72, %57, %cst_30 {dimension_numbers = #tpu.dot_dimension_numbers<[1], [0], [0], [1], [0, 0, 1, 1], [], []>} : vector<8x8xf32>, vector<8x16xf32>, vector<8x16xf32> -> vector<8x16xf32>
    %74 = vector.extract_strided_slice %54 {offsets = [0, 16], sizes = [8, 16], strides = [1, 1]} : vector<16x96xf32> to vector<8x16xf32>
    %75 = vector.extract_strided_slice %54 {offsets = [0, 48], sizes = [8, 16], strides = [1, 1]} : vector<16x96xf32> to vector<8x16xf32>
    %76 = vector.extract_strided_slice %54 {offsets = [0, 80], sizes = [8, 16], strides = [1, 1]} : vector<16x96xf32> to vector<8x16xf32>
    %cst_31 = arith.constant dense<0.000000e+00> : vector<8x8xf32>
    %77 = tpu.matmul %74, %75, %cst_31 {dimension_numbers = #tpu.dot_dimension_numbers<[1], [1], [0], [0], [0, 0, 1, 0], [], []>} : vector<8x16xf32>, vector<8x16xf32>, vector<8x8xf32> -> vector<8x8xf32>
    %cst_32 = arith.constant 2.500000e-01 : f32
    %78 = vector.broadcast %cst_32 : f32 to vector<8x8xf32>
    %79 = arith.mulf %77, %78 : vector<8x8xf32>
    %cst_33 = arith.constant -1.000000e+30 : f32
    %80 = vector.broadcast %cst_33 : f32 to vector<8x8xf32>
    %81 = arith.select %18, %79, %80 : vector<8x8xi1>, vector<8x8xf32>
    %cst_34 = arith.constant dense<0xFF800000> : vector<8xf32>
    %82 = vector.multi_reduction <maximumf>, %81, %cst_34 [1] : vector<8x8xf32> to vector<8xf32>
    %83 = vector.shape_cast %82 : vector<8xf32> to vector<8x1xf32>
    %84 = vector.broadcast %83 : vector<8x1xf32> to vector<8x8xf32>
    %85 = arith.subf %81, %84 : vector<8x8xf32>
    %86 = math.exp %85 : vector<8x8xf32>
    %cst_35 = arith.constant dense<0.000000e+00> : vector<8xf32>
    %87 = vector.multi_reduction <add>, %86, %cst_35 [1] : vector<8x8xf32> to vector<8xf32>
    %88 = vector.shape_cast %87 : vector<8xf32> to vector<8x1xf32>
    %89 = tpu.reciprocal %88 {approx = true} : vector<8x1xf32> -> vector<8x1xf32>
    %90 = vector.broadcast %89 : vector<8x1xf32> to vector<8x8xf32>
    %91 = arith.mulf %86, %90 : vector<8x8xf32>
    %cst_36 = arith.constant dense<0.000000e+00> : vector<8x16xf32>
    %92 = tpu.matmul %91, %76, %cst_36 {dimension_numbers = #tpu.dot_dimension_numbers<[1], [0], [0], [1], [0, 0, 1, 1], [], []>} : vector<8x8xf32>, vector<8x16xf32>, vector<8x16xf32> -> vector<8x16xf32>
    %93 = tpu.concatenate %73, %92 in 1 : vector<8x16xf32>, vector<8x16xf32> -> vector<8x32xf32>
    %94 = vector.extract_strided_slice %54 {offsets = [8, 0], sizes = [8, 16], strides = [1, 1]} : vector<16x96xf32> to vector<8x16xf32>
    %95 = vector.extract_strided_slice %54 {offsets = [8, 32], sizes = [8, 16], strides = [1, 1]} : vector<16x96xf32> to vector<8x16xf32>
    %96 = vector.extract_strided_slice %54 {offsets = [8, 64], sizes = [8, 16], strides = [1, 1]} : vector<16x96xf32> to vector<8x16xf32>
    %cst_37 = arith.constant dense<0.000000e+00> : vector<8x8xf32>
    %97 = tpu.matmul %94, %95, %cst_37 {dimension_numbers = #tpu.dot_dimension_numbers<[1], [1], [0], [0], [0, 0, 1, 0], [], []>} : vector<8x16xf32>, vector<8x16xf32>, vector<8x8xf32> -> vector<8x8xf32>
    %cst_38 = arith.constant 2.500000e-01 : f32
    %98 = vector.broadcast %cst_38 : f32 to vector<8x8xf32>
    %99 = arith.mulf %97, %98 : vector<8x8xf32>
    %cst_39 = arith.constant -1.000000e+30 : f32
    %100 = vector.broadcast %cst_39 : f32 to vector<8x8xf32>
    %101 = arith.select %18, %99, %100 : vector<8x8xi1>, vector<8x8xf32>
    %cst_40 = arith.constant dense<0xFF800000> : vector<8xf32>
    %102 = vector.multi_reduction <maximumf>, %101, %cst_40 [1] : vector<8x8xf32> to vector<8xf32>
    %103 = vector.shape_cast %102 : vector<8xf32> to vector<8x1xf32>
    %104 = vector.broadcast %103 : vector<8x1xf32> to vector<8x8xf32>
    %105 = arith.subf %101, %104 : vector<8x8xf32>
    %106 = math.exp %105 : vector<8x8xf32>
    %cst_41 = arith.constant dense<0.000000e+00> : vector<8xf32>
    %107 = vector.multi_reduction <add>, %106, %cst_41 [1] : vector<8x8xf32> to vector<8xf32>
    %108 = vector.shape_cast %107 : vector<8xf32> to vector<8x1xf32>
    %109 = tpu.reciprocal %108 {approx = true} : vector<8x1xf32> -> vector<8x1xf32>
    %110 = vector.broadcast %109 : vector<8x1xf32> to vector<8x8xf32>
    %111 = arith.mulf %106, %110 : vector<8x8xf32>
    %cst_42 = arith.constant dense<0.000000e+00> : vector<8x16xf32>
    %112 = tpu.matmul %111, %96, %cst_42 {dimension_numbers = #tpu.dot_dimension_numbers<[1], [0], [0], [1], [0, 0, 1, 1], [], []>} : vector<8x8xf32>, vector<8x16xf32>, vector<8x16xf32> -> vector<8x16xf32>
    %113 = vector.extract_strided_slice %54 {offsets = [8, 16], sizes = [8, 16], strides = [1, 1]} : vector<16x96xf32> to vector<8x16xf32>
    %114 = vector.extract_strided_slice %54 {offsets = [8, 48], sizes = [8, 16], strides = [1, 1]} : vector<16x96xf32> to vector<8x16xf32>
    %115 = vector.extract_strided_slice %54 {offsets = [8, 80], sizes = [8, 16], strides = [1, 1]} : vector<16x96xf32> to vector<8x16xf32>
    %cst_43 = arith.constant dense<0.000000e+00> : vector<8x8xf32>
    %116 = tpu.matmul %113, %114, %cst_43 {dimension_numbers = #tpu.dot_dimension_numbers<[1], [1], [0], [0], [0, 0, 1, 0], [], []>} : vector<8x16xf32>, vector<8x16xf32>, vector<8x8xf32> -> vector<8x8xf32>
    %cst_44 = arith.constant 2.500000e-01 : f32
    %117 = vector.broadcast %cst_44 : f32 to vector<8x8xf32>
    %118 = arith.mulf %116, %117 : vector<8x8xf32>
    %cst_45 = arith.constant -1.000000e+30 : f32
    %119 = vector.broadcast %cst_45 : f32 to vector<8x8xf32>
    %120 = arith.select %18, %118, %119 : vector<8x8xi1>, vector<8x8xf32>
    %cst_46 = arith.constant dense<0xFF800000> : vector<8xf32>
    %121 = vector.multi_reduction <maximumf>, %120, %cst_46 [1] : vector<8x8xf32> to vector<8xf32>
    %122 = vector.shape_cast %121 : vector<8xf32> to vector<8x1xf32>
    %123 = vector.broadcast %122 : vector<8x1xf32> to vector<8x8xf32>
    %124 = arith.subf %120, %123 : vector<8x8xf32>
    %125 = math.exp %124 : vector<8x8xf32>
    %cst_47 = arith.constant dense<0.000000e+00> : vector<8xf32>
    %126 = vector.multi_reduction <add>, %125, %cst_47 [1] : vector<8x8xf32> to vector<8xf32>
    %127 = vector.shape_cast %126 : vector<8xf32> to vector<8x1xf32>
    %128 = tpu.reciprocal %127 {approx = true} : vector<8x1xf32> -> vector<8x1xf32>
    %129 = vector.broadcast %128 : vector<8x1xf32> to vector<8x8xf32>
    %130 = arith.mulf %125, %129 : vector<8x8xf32>
    %cst_48 = arith.constant dense<0.000000e+00> : vector<8x16xf32>
    %131 = tpu.matmul %130, %115, %cst_48 {dimension_numbers = #tpu.dot_dimension_numbers<[1], [0], [0], [1], [0, 0, 1, 1], [], []>} : vector<8x8xf32>, vector<8x16xf32>, vector<8x16xf32> -> vector<8x16xf32>
    %132 = tpu.concatenate %112, %131 in 1 : vector<8x16xf32>, vector<8x16xf32> -> vector<8x32xf32>
    %133 = tpu.concatenate %93, %132 in 0 : vector<8x32xf32>, vector<8x32xf32> -> vector<16x32xf32>
    %c0_49 = arith.constant 0 : index
    %c0_50 = arith.constant 0 : index
    %c0_51 = arith.constant 0 : index
    %134 = vector.load %arg6[%c0_49, %c0_50, %c0_51] : memref<2x32x32xbf16, #tpu.memory_space<vmem>>, vector<1x32x32xbf16>
    %135 = vector.shape_cast %134 : vector<1x32x32xbf16> to vector<32x32xbf16>
    %136 = arith.truncf %133 : vector<16x32xf32> to vector<16x32xbf16>
    %cst_52 = arith.constant dense<0.000000e+00> : vector<16x32xf32>
    %137 = tpu.matmul %136, %135, %cst_52 {dimension_numbers = #tpu.dot_dimension_numbers<[1], [1], [0], [0], [0, 0, 1, 0], [], []>} : vector<16x32xbf16>, vector<32x32xbf16>, vector<16x32xf32> -> vector<16x32xf32>
    %138 = vector.broadcast %22 : vector<1x32xf32> to vector<16x32xf32>
    %139 = arith.addf %137, %138 : vector<16x32xf32>
    %140 = arith.addf %15, %139 : vector<16x32xf32>
    %cst_53 = arith.constant dense<0.000000e+00> : vector<16xf32>
    %141 = vector.multi_reduction <add>, %140, %cst_53 [1] : vector<16x32xf32> to vector<16xf32>
    %142 = vector.shape_cast %141 : vector<16xf32> to vector<16x1xf32>
    %cst_54 = arith.constant 3.200000e+01 : f32
    %143 = vector.broadcast %cst_54 : f32 to vector<16x1xf32>
    %144 = arith.divf %142, %143 : vector<16x1xf32>
    %145 = vector.broadcast %144 : vector<16x1xf32> to vector<16x32xf32>
    %146 = arith.subf %140, %145 : vector<16x32xf32>
    %147 = arith.mulf %146, %146 : vector<16x32xf32>
    %cst_55 = arith.constant dense<0.000000e+00> : vector<16xf32>
    %148 = vector.multi_reduction <add>, %147, %cst_55 [1] : vector<16x32xf32> to vector<16xf32>
    %149 = vector.shape_cast %148 : vector<16xf32> to vector<16x1xf32>
    %cst_56 = arith.constant 3.200000e+01 : f32
    %150 = vector.broadcast %cst_56 : f32 to vector<16x1xf32>
    %151 = arith.divf %149, %150 : vector<16x1xf32>
    %152 = vector.broadcast %144 : vector<16x1xf32> to vector<16x32xf32>
    %153 = arith.subf %140, %152 : vector<16x32xf32>
    %cst_57 = arith.constant 9.99999974E-6 : f32
    %154 = vector.broadcast %cst_57 : f32 to vector<16x1xf32>
    %155 = arith.addf %151, %154 : vector<16x1xf32>
    %156 = math.rsqrt %155 : vector<16x1xf32>
    %157 = vector.broadcast %156 : vector<16x1xf32> to vector<16x32xf32>
    %158 = arith.mulf %153, %157 : vector<16x32xf32>
    %159 = vector.broadcast %23 : vector<1x32xf32> to vector<16x32xf32>
    %160 = arith.mulf %158, %159 : vector<16x32xf32>
    %161 = vector.broadcast %24 : vector<1x32xf32> to vector<16x32xf32>
    %162 = arith.addf %160, %161 : vector<16x32xf32>
    %c0_58 = arith.constant 0 : index
    %c0_59 = arith.constant 0 : index
    %c0_60 = arith.constant 0 : index
    %163 = vector.load %arg7[%c0_58, %c0_59, %c0_60] : memref<2x128x32xbf16, #tpu.memory_space<vmem>>, vector<1x128x32xbf16>
    %164 = vector.shape_cast %163 : vector<1x128x32xbf16> to vector<128x32xbf16>
    %165 = arith.truncf %162 : vector<16x32xf32> to vector<16x32xbf16>
    %cst_61 = arith.constant dense<0.000000e+00> : vector<16x128xf32>
    %166 = tpu.matmul %165, %164, %cst_61 {dimension_numbers = #tpu.dot_dimension_numbers<[1], [1], [0], [0], [0, 0, 1, 0], [], []>} : vector<16x32xbf16>, vector<128x32xbf16>, vector<16x128xf32> -> vector<16x128xf32>
    %167 = vector.broadcast %25 : vector<1x128xf32> to vector<16x128xf32>
    %168 = arith.addf %166, %167 : vector<16x128xf32>
    %cst_62 = arith.constant 5.000000e-01 : f32
    %169 = vector.broadcast %cst_62 : f32 to vector<16x128xf32>
    %170 = arith.mulf %169, %168 : vector<16x128xf32>
    %cst_63 = arith.constant 0.707106769 : f32
    %171 = vector.broadcast %cst_63 : f32 to vector<16x128xf32>
    %172 = arith.mulf %168, %171 : vector<16x128xf32>
    %173 = math.absf %172 : vector<16x128xf32>
    %cst_64 = arith.constant 0.327591091 : f32
    %174 = vector.broadcast %cst_64 : f32 to vector<16x128xf32>
    %175 = arith.mulf %174, %173 : vector<16x128xf32>
    %cst_65 = arith.constant 1.000000e+00 : f32
    %176 = vector.broadcast %cst_65 : f32 to vector<16x128xf32>
    %177 = arith.addf %176, %175 : vector<16x128xf32>
    %cst_66 = arith.constant 1.000000e+00 : f32
    %178 = vector.broadcast %cst_66 : f32 to vector<16x128xf32>
    %179 = arith.divf %178, %177 : vector<16x128xf32>
    %cst_67 = arith.constant 1.06140542 : f32
    %180 = vector.broadcast %cst_67 : f32 to vector<16x128xf32>
    %181 = arith.mulf %180, %179 : vector<16x128xf32>
    %cst_68 = arith.constant -1.45315206 : f32
    %182 = vector.broadcast %cst_68 : f32 to vector<16x128xf32>
    %183 = arith.addf %181, %182 : vector<16x128xf32>
    %184 = arith.mulf %183, %179 : vector<16x128xf32>
    %cst_69 = arith.constant 1.42141378 : f32
    %185 = vector.broadcast %cst_69 : f32 to vector<16x128xf32>
    %186 = arith.addf %184, %185 : vector<16x128xf32>
    %187 = arith.mulf %186, %179 : vector<16x128xf32>
    %cst_70 = arith.constant -0.284496725 : f32
    %188 = vector.broadcast %cst_70 : f32 to vector<16x128xf32>
    %189 = arith.addf %187, %188 : vector<16x128xf32>
    %190 = arith.mulf %189, %179 : vector<16x128xf32>
    %cst_71 = arith.constant 0.254829586 : f32
    %191 = vector.broadcast %cst_71 : f32 to vector<16x128xf32>
    %192 = arith.addf %190, %191 : vector<16x128xf32>
    %193 = arith.mulf %192, %179 : vector<16x128xf32>
    %194 = arith.mulf %173, %173 : vector<16x128xf32>
    %cst_72 = arith.constant 0.000000e+00 : f32
    %195 = vector.broadcast %cst_72 : f32 to vector<16x128xf32>
    %196 = arith.subf %195, %194 : vector<16x128xf32>
    %197 = math.exp %196 : vector<16x128xf32>
    %198 = arith.mulf %193, %197 : vector<16x128xf32>
    %cst_73 = arith.constant 1.000000e+00 : f32
    %199 = vector.broadcast %cst_73 : f32 to vector<16x128xf32>
    %200 = arith.subf %199, %198 : vector<16x128xf32>
    %cst_74 = arith.constant 0.000000e+00 : f32
    %201 = vector.broadcast %cst_74 : f32 to vector<16x128xf32>
    %202 = arith.cmpf oge, %172, %201 : vector<16x128xf32>
    %cst_75 = arith.constant 0.000000e+00 : f32
    %203 = vector.broadcast %cst_75 : f32 to vector<16x128xf32>
    %204 = arith.subf %203, %200 : vector<16x128xf32>
    %205 = arith.select %202, %200, %204 : vector<16x128xi1>, vector<16x128xf32>
    %cst_76 = arith.constant 1.000000e+00 : f32
    %206 = vector.broadcast %cst_76 : f32 to vector<16x128xf32>
    %207 = arith.addf %206, %205 : vector<16x128xf32>
    %208 = arith.mulf %170, %207 : vector<16x128xf32>
    %c0_77 = arith.constant 0 : index
    %c0_78 = arith.constant 0 : index
    %c0_79 = arith.constant 0 : index
    %209 = vector.load %arg8[%c0_77, %c0_78, %c0_79] : memref<2x32x128xbf16, #tpu.memory_space<vmem>>, vector<1x32x128xbf16>
    %210 = vector.shape_cast %209 : vector<1x32x128xbf16> to vector<32x128xbf16>
    %211 = arith.truncf %208 : vector<16x128xf32> to vector<16x128xbf16>
    %cst_80 = arith.constant dense<0.000000e+00> : vector<16x32xf32>
    %212 = tpu.matmul %211, %210, %cst_80 {dimension_numbers = #tpu.dot_dimension_numbers<[1], [1], [0], [0], [0, 0, 1, 0], [], []>} : vector<16x128xbf16>, vector<32x128xbf16>, vector<16x32xf32> -> vector<16x32xf32>
    %213 = vector.broadcast %26 : vector<1x32xf32> to vector<16x32xf32>
    %214 = arith.addf %212, %213 : vector<16x32xf32>
    %215 = arith.addf %140, %214 : vector<16x32xf32>
    %c1 = arith.constant 1 : index
    %c0_81 = arith.constant 0 : index
    %216 = vector.load %arg4[%c1, %c0_81] : memref<3x416xf32, #tpu.memory_space<vmem>>, vector<1x32xf32>
    %c1_82 = arith.constant 1 : index
    %c32_83 = arith.constant 32 : index
    %217 = vector.load %arg4[%c1_82, %c32_83] : memref<3x416xf32, #tpu.memory_space<vmem>>, vector<1x32xf32>
    %c1_84 = arith.constant 1 : index
    %c64_85 = arith.constant 64 : index
    %218 = vector.load %arg4[%c1_84, %c64_85] : memref<3x416xf32, #tpu.memory_space<vmem>>, vector<1x96xf32>
    %c1_86 = arith.constant 1 : index
    %c160_87 = arith.constant 160 : index
    %219 = vector.load %arg4[%c1_86, %c160_87] : memref<3x416xf32, #tpu.memory_space<vmem>>, vector<1x32xf32>
    %c1_88 = arith.constant 1 : index
    %c192_89 = arith.constant 192 : index
    %220 = vector.load %arg4[%c1_88, %c192_89] : memref<3x416xf32, #tpu.memory_space<vmem>>, vector<1x32xf32>
    %c1_90 = arith.constant 1 : index
    %c224_91 = arith.constant 224 : index
    %221 = vector.load %arg4[%c1_90, %c224_91] : memref<3x416xf32, #tpu.memory_space<vmem>>, vector<1x32xf32>
    %c1_92 = arith.constant 1 : index
    %c256_93 = arith.constant 256 : index
    %222 = vector.load %arg4[%c1_92, %c256_93] : memref<3x416xf32, #tpu.memory_space<vmem>>, vector<1x128xf32>
    %c1_94 = arith.constant 1 : index
    %c384_95 = arith.constant 384 : index
    %223 = vector.load %arg4[%c1_94, %c384_95] : memref<3x416xf32, #tpu.memory_space<vmem>>, vector<1x32xf32>
    %cst_96 = arith.constant dense<0.000000e+00> : vector<16xf32>
    %224 = vector.multi_reduction <add>, %215, %cst_96 [1] : vector<16x32xf32> to vector<16xf32>
    %225 = vector.shape_cast %224 : vector<16xf32> to vector<16x1xf32>
    %cst_97 = arith.constant 3.200000e+01 : f32
    %226 = vector.broadcast %cst_97 : f32 to vector<16x1xf32>
    %227 = arith.divf %225, %226 : vector<16x1xf32>
    %228 = vector.broadcast %227 : vector<16x1xf32> to vector<16x32xf32>
    %229 = arith.subf %215, %228 : vector<16x32xf32>
    %230 = arith.mulf %229, %229 : vector<16x32xf32>
    %cst_98 = arith.constant dense<0.000000e+00> : vector<16xf32>
    %231 = vector.multi_reduction <add>, %230, %cst_98 [1] : vector<16x32xf32> to vector<16xf32>
    %232 = vector.shape_cast %231 : vector<16xf32> to vector<16x1xf32>
    %cst_99 = arith.constant 3.200000e+01 : f32
    %233 = vector.broadcast %cst_99 : f32 to vector<16x1xf32>
    %234 = arith.divf %232, %233 : vector<16x1xf32>
    %235 = vector.broadcast %227 : vector<16x1xf32> to vector<16x32xf32>
    %236 = arith.subf %215, %235 : vector<16x32xf32>
    %cst_100 = arith.constant 9.99999974E-6 : f32
    %237 = vector.broadcast %cst_100 : f32 to vector<16x1xf32>
    %238 = arith.addf %234, %237 : vector<16x1xf32>
    %239 = math.rsqrt %238 : vector<16x1xf32>
    %240 = vector.broadcast %239 : vector<16x1xf32> to vector<16x32xf32>
    %241 = arith.mulf %236, %240 : vector<16x32xf32>
    %242 = vector.broadcast %216 : vector<1x32xf32> to vector<16x32xf32>
    %243 = arith.mulf %241, %242 : vector<16x32xf32>
    %244 = vector.broadcast %217 : vector<1x32xf32> to vector<16x32xf32>
    %245 = arith.addf %243, %244 : vector<16x32xf32>
    %c1_101 = arith.constant 1 : index
    %c0_102 = arith.constant 0 : index
    %c0_103 = arith.constant 0 : index
    %246 = vector.load %arg5[%c1_101, %c0_102, %c0_103] : memref<2x96x32xbf16, #tpu.memory_space<vmem>>, vector<1x96x32xbf16>
    %247 = vector.shape_cast %246 : vector<1x96x32xbf16> to vector<96x32xbf16>
    %248 = arith.truncf %245 : vector<16x32xf32> to vector<16x32xbf16>
    %cst_104 = arith.constant dense<0.000000e+00> : vector<16x96xf32>
    %249 = tpu.matmul %248, %247, %cst_104 {dimension_numbers = #tpu.dot_dimension_numbers<[1], [1], [0], [0], [0, 0, 1, 0], [], []>} : vector<16x32xbf16>, vector<96x32xbf16>, vector<16x96xf32> -> vector<16x96xf32>
    %250 = vector.broadcast %218 : vector<1x96xf32> to vector<16x96xf32>
    %251 = arith.addf %249, %250 : vector<16x96xf32>
    %252 = vector.extract_strided_slice %251 {offsets = [0, 0], sizes = [8, 16], strides = [1, 1]} : vector<16x96xf32> to vector<8x16xf32>
    %253 = vector.extract_strided_slice %251 {offsets = [0, 32], sizes = [8, 16], strides = [1, 1]} : vector<16x96xf32> to vector<8x16xf32>
    %254 = vector.extract_strided_slice %251 {offsets = [0, 64], sizes = [8, 16], strides = [1, 1]} : vector<16x96xf32> to vector<8x16xf32>
    %cst_105 = arith.constant dense<0.000000e+00> : vector<8x8xf32>
    %255 = tpu.matmul %252, %253, %cst_105 {dimension_numbers = #tpu.dot_dimension_numbers<[1], [1], [0], [0], [0, 0, 1, 0], [], []>} : vector<8x16xf32>, vector<8x16xf32>, vector<8x8xf32> -> vector<8x8xf32>
    %cst_106 = arith.constant 2.500000e-01 : f32
    %256 = vector.broadcast %cst_106 : f32 to vector<8x8xf32>
    %257 = arith.mulf %255, %256 : vector<8x8xf32>
    %cst_107 = arith.constant -1.000000e+30 : f32
    %258 = vector.broadcast %cst_107 : f32 to vector<8x8xf32>
    %259 = arith.select %18, %257, %258 : vector<8x8xi1>, vector<8x8xf32>
    %cst_108 = arith.constant dense<0xFF800000> : vector<8xf32>
    %260 = vector.multi_reduction <maximumf>, %259, %cst_108 [1] : vector<8x8xf32> to vector<8xf32>
    %261 = vector.shape_cast %260 : vector<8xf32> to vector<8x1xf32>
    %262 = vector.broadcast %261 : vector<8x1xf32> to vector<8x8xf32>
    %263 = arith.subf %259, %262 : vector<8x8xf32>
    %264 = math.exp %263 : vector<8x8xf32>
    %cst_109 = arith.constant dense<0.000000e+00> : vector<8xf32>
    %265 = vector.multi_reduction <add>, %264, %cst_109 [1] : vector<8x8xf32> to vector<8xf32>
    %266 = vector.shape_cast %265 : vector<8xf32> to vector<8x1xf32>
    %267 = tpu.reciprocal %266 {approx = true} : vector<8x1xf32> -> vector<8x1xf32>
    %268 = vector.broadcast %267 : vector<8x1xf32> to vector<8x8xf32>
    %269 = arith.mulf %264, %268 : vector<8x8xf32>
    %cst_110 = arith.constant dense<0.000000e+00> : vector<8x16xf32>
    %270 = tpu.matmul %269, %254, %cst_110 {dimension_numbers = #tpu.dot_dimension_numbers<[1], [0], [0], [1], [0, 0, 1, 1], [], []>} : vector<8x8xf32>, vector<8x16xf32>, vector<8x16xf32> -> vector<8x16xf32>
    %271 = vector.extract_strided_slice %251 {offsets = [0, 16], sizes = [8, 16], strides = [1, 1]} : vector<16x96xf32> to vector<8x16xf32>
    %272 = vector.extract_strided_slice %251 {offsets = [0, 48], sizes = [8, 16], strides = [1, 1]} : vector<16x96xf32> to vector<8x16xf32>
    %273 = vector.extract_strided_slice %251 {offsets = [0, 80], sizes = [8, 16], strides = [1, 1]} : vector<16x96xf32> to vector<8x16xf32>
    %cst_111 = arith.constant dense<0.000000e+00> : vector<8x8xf32>
    %274 = tpu.matmul %271, %272, %cst_111 {dimension_numbers = #tpu.dot_dimension_numbers<[1], [1], [0], [0], [0, 0, 1, 0], [], []>} : vector<8x16xf32>, vector<8x16xf32>, vector<8x8xf32> -> vector<8x8xf32>
    %cst_112 = arith.constant 2.500000e-01 : f32
    %275 = vector.broadcast %cst_112 : f32 to vector<8x8xf32>
    %276 = arith.mulf %274, %275 : vector<8x8xf32>
    %cst_113 = arith.constant -1.000000e+30 : f32
    %277 = vector.broadcast %cst_113 : f32 to vector<8x8xf32>
    %278 = arith.select %18, %276, %277 : vector<8x8xi1>, vector<8x8xf32>
    %cst_114 = arith.constant dense<0xFF800000> : vector<8xf32>
    %279 = vector.multi_reduction <maximumf>, %278, %cst_114 [1] : vector<8x8xf32> to vector<8xf32>
    %280 = vector.shape_cast %279 : vector<8xf32> to vector<8x1xf32>
    %281 = vector.broadcast %280 : vector<8x1xf32> to vector<8x8xf32>
    %282 = arith.subf %278, %281 : vector<8x8xf32>
    %283 = math.exp %282 : vector<8x8xf32>
    %cst_115 = arith.constant dense<0.000000e+00> : vector<8xf32>
    %284 = vector.multi_reduction <add>, %283, %cst_115 [1] : vector<8x8xf32> to vector<8xf32>
    %285 = vector.shape_cast %284 : vector<8xf32> to vector<8x1xf32>
    %286 = tpu.reciprocal %285 {approx = true} : vector<8x1xf32> -> vector<8x1xf32>
    %287 = vector.broadcast %286 : vector<8x1xf32> to vector<8x8xf32>
    %288 = arith.mulf %283, %287 : vector<8x8xf32>
    %cst_116 = arith.constant dense<0.000000e+00> : vector<8x16xf32>
    %289 = tpu.matmul %288, %273, %cst_116 {dimension_numbers = #tpu.dot_dimension_numbers<[1], [0], [0], [1], [0, 0, 1, 1], [], []>} : vector<8x8xf32>, vector<8x16xf32>, vector<8x16xf32> -> vector<8x16xf32>
    %290 = tpu.concatenate %270, %289 in 1 : vector<8x16xf32>, vector<8x16xf32> -> vector<8x32xf32>
    %291 = vector.extract_strided_slice %251 {offsets = [8, 0], sizes = [8, 16], strides = [1, 1]} : vector<16x96xf32> to vector<8x16xf32>
    %292 = vector.extract_strided_slice %251 {offsets = [8, 32], sizes = [8, 16], strides = [1, 1]} : vector<16x96xf32> to vector<8x16xf32>
    %293 = vector.extract_strided_slice %251 {offsets = [8, 64], sizes = [8, 16], strides = [1, 1]} : vector<16x96xf32> to vector<8x16xf32>
    %cst_117 = arith.constant dense<0.000000e+00> : vector<8x8xf32>
    %294 = tpu.matmul %291, %292, %cst_117 {dimension_numbers = #tpu.dot_dimension_numbers<[1], [1], [0], [0], [0, 0, 1, 0], [], []>} : vector<8x16xf32>, vector<8x16xf32>, vector<8x8xf32> -> vector<8x8xf32>
    %cst_118 = arith.constant 2.500000e-01 : f32
    %295 = vector.broadcast %cst_118 : f32 to vector<8x8xf32>
    %296 = arith.mulf %294, %295 : vector<8x8xf32>
    %cst_119 = arith.constant -1.000000e+30 : f32
    %297 = vector.broadcast %cst_119 : f32 to vector<8x8xf32>
    %298 = arith.select %18, %296, %297 : vector<8x8xi1>, vector<8x8xf32>
    %cst_120 = arith.constant dense<0xFF800000> : vector<8xf32>
    %299 = vector.multi_reduction <maximumf>, %298, %cst_120 [1] : vector<8x8xf32> to vector<8xf32>
    %300 = vector.shape_cast %299 : vector<8xf32> to vector<8x1xf32>
    %301 = vector.broadcast %300 : vector<8x1xf32> to vector<8x8xf32>
    %302 = arith.subf %298, %301 : vector<8x8xf32>
    %303 = math.exp %302 : vector<8x8xf32>
    %cst_121 = arith.constant dense<0.000000e+00> : vector<8xf32>
    %304 = vector.multi_reduction <add>, %303, %cst_121 [1] : vector<8x8xf32> to vector<8xf32>
    %305 = vector.shape_cast %304 : vector<8xf32> to vector<8x1xf32>
    %306 = tpu.reciprocal %305 {approx = true} : vector<8x1xf32> -> vector<8x1xf32>
    %307 = vector.broadcast %306 : vector<8x1xf32> to vector<8x8xf32>
    %308 = arith.mulf %303, %307 : vector<8x8xf32>
    %cst_122 = arith.constant dense<0.000000e+00> : vector<8x16xf32>
    %309 = tpu.matmul %308, %293, %cst_122 {dimension_numbers = #tpu.dot_dimension_numbers<[1], [0], [0], [1], [0, 0, 1, 1], [], []>} : vector<8x8xf32>, vector<8x16xf32>, vector<8x16xf32> -> vector<8x16xf32>
    %310 = vector.extract_strided_slice %251 {offsets = [8, 16], sizes = [8, 16], strides = [1, 1]} : vector<16x96xf32> to vector<8x16xf32>
    %311 = vector.extract_strided_slice %251 {offsets = [8, 48], sizes = [8, 16], strides = [1, 1]} : vector<16x96xf32> to vector<8x16xf32>
    %312 = vector.extract_strided_slice %251 {offsets = [8, 80], sizes = [8, 16], strides = [1, 1]} : vector<16x96xf32> to vector<8x16xf32>
    %cst_123 = arith.constant dense<0.000000e+00> : vector<8x8xf32>
    %313 = tpu.matmul %310, %311, %cst_123 {dimension_numbers = #tpu.dot_dimension_numbers<[1], [1], [0], [0], [0, 0, 1, 0], [], []>} : vector<8x16xf32>, vector<8x16xf32>, vector<8x8xf32> -> vector<8x8xf32>
    %cst_124 = arith.constant 2.500000e-01 : f32
    %314 = vector.broadcast %cst_124 : f32 to vector<8x8xf32>
    %315 = arith.mulf %313, %314 : vector<8x8xf32>
    %cst_125 = arith.constant -1.000000e+30 : f32
    %316 = vector.broadcast %cst_125 : f32 to vector<8x8xf32>
    %317 = arith.select %18, %315, %316 : vector<8x8xi1>, vector<8x8xf32>
    %cst_126 = arith.constant dense<0xFF800000> : vector<8xf32>
    %318 = vector.multi_reduction <maximumf>, %317, %cst_126 [1] : vector<8x8xf32> to vector<8xf32>
    %319 = vector.shape_cast %318 : vector<8xf32> to vector<8x1xf32>
    %320 = vector.broadcast %319 : vector<8x1xf32> to vector<8x8xf32>
    %321 = arith.subf %317, %320 : vector<8x8xf32>
    %322 = math.exp %321 : vector<8x8xf32>
    %cst_127 = arith.constant dense<0.000000e+00> : vector<8xf32>
    %323 = vector.multi_reduction <add>, %322, %cst_127 [1] : vector<8x8xf32> to vector<8xf32>
    %324 = vector.shape_cast %323 : vector<8xf32> to vector<8x1xf32>
    %325 = tpu.reciprocal %324 {approx = true} : vector<8x1xf32> -> vector<8x1xf32>
    %326 = vector.broadcast %325 : vector<8x1xf32> to vector<8x8xf32>
    %327 = arith.mulf %322, %326 : vector<8x8xf32>
    %cst_128 = arith.constant dense<0.000000e+00> : vector<8x16xf32>
    %328 = tpu.matmul %327, %312, %cst_128 {dimension_numbers = #tpu.dot_dimension_numbers<[1], [0], [0], [1], [0, 0, 1, 1], [], []>} : vector<8x8xf32>, vector<8x16xf32>, vector<8x16xf32> -> vector<8x16xf32>
    %329 = tpu.concatenate %309, %328 in 1 : vector<8x16xf32>, vector<8x16xf32> -> vector<8x32xf32>
    %330 = tpu.concatenate %290, %329 in 0 : vector<8x32xf32>, vector<8x32xf32> -> vector<16x32xf32>
    %c1_129 = arith.constant 1 : index
    %c0_130 = arith.constant 0 : index
    %c0_131 = arith.constant 0 : index
    %331 = vector.load %arg6[%c1_129, %c0_130, %c0_131] : memref<2x32x32xbf16, #tpu.memory_space<vmem>>, vector<1x32x32xbf16>
    %332 = vector.shape_cast %331 : vector<1x32x32xbf16> to vector<32x32xbf16>
    %333 = arith.truncf %330 : vector<16x32xf32> to vector<16x32xbf16>
    %cst_132 = arith.constant dense<0.000000e+00> : vector<16x32xf32>
    %334 = tpu.matmul %333, %332, %cst_132 {dimension_numbers = #tpu.dot_dimension_numbers<[1], [1], [0], [0], [0, 0, 1, 0], [], []>} : vector<16x32xbf16>, vector<32x32xbf16>, vector<16x32xf32> -> vector<16x32xf32>
    %335 = vector.broadcast %219 : vector<1x32xf32> to vector<16x32xf32>
    %336 = arith.addf %334, %335 : vector<16x32xf32>
    %337 = arith.addf %215, %336 : vector<16x32xf32>
    %cst_133 = arith.constant dense<0.000000e+00> : vector<16xf32>
    %338 = vector.multi_reduction <add>, %337, %cst_133 [1] : vector<16x32xf32> to vector<16xf32>
    %339 = vector.shape_cast %338 : vector<16xf32> to vector<16x1xf32>
    %cst_134 = arith.constant 3.200000e+01 : f32
    %340 = vector.broadcast %cst_134 : f32 to vector<16x1xf32>
    %341 = arith.divf %339, %340 : vector<16x1xf32>
    %342 = vector.broadcast %341 : vector<16x1xf32> to vector<16x32xf32>
    %343 = arith.subf %337, %342 : vector<16x32xf32>
    %344 = arith.mulf %343, %343 : vector<16x32xf32>
    %cst_135 = arith.constant dense<0.000000e+00> : vector<16xf32>
    %345 = vector.multi_reduction <add>, %344, %cst_135 [1] : vector<16x32xf32> to vector<16xf32>
    %346 = vector.shape_cast %345 : vector<16xf32> to vector<16x1xf32>
    %cst_136 = arith.constant 3.200000e+01 : f32
    %347 = vector.broadcast %cst_136 : f32 to vector<16x1xf32>
    %348 = arith.divf %346, %347 : vector<16x1xf32>
    %349 = vector.broadcast %341 : vector<16x1xf32> to vector<16x32xf32>
    %350 = arith.subf %337, %349 : vector<16x32xf32>
    %cst_137 = arith.constant 9.99999974E-6 : f32
    %351 = vector.broadcast %cst_137 : f32 to vector<16x1xf32>
    %352 = arith.addf %348, %351 : vector<16x1xf32>
    %353 = math.rsqrt %352 : vector<16x1xf32>
    %354 = vector.broadcast %353 : vector<16x1xf32> to vector<16x32xf32>
    %355 = arith.mulf %350, %354 : vector<16x32xf32>
    %356 = vector.broadcast %220 : vector<1x32xf32> to vector<16x32xf32>
    %357 = arith.mulf %355, %356 : vector<16x32xf32>
    %358 = vector.broadcast %221 : vector<1x32xf32> to vector<16x32xf32>
    %359 = arith.addf %357, %358 : vector<16x32xf32>
    %c1_138 = arith.constant 1 : index
    %c0_139 = arith.constant 0 : index
    %c0_140 = arith.constant 0 : index
    %360 = vector.load %arg7[%c1_138, %c0_139, %c0_140] : memref<2x128x32xbf16, #tpu.memory_space<vmem>>, vector<1x128x32xbf16>
    %361 = vector.shape_cast %360 : vector<1x128x32xbf16> to vector<128x32xbf16>
    %362 = arith.truncf %359 : vector<16x32xf32> to vector<16x32xbf16>
    %cst_141 = arith.constant dense<0.000000e+00> : vector<16x128xf32>
    %363 = tpu.matmul %362, %361, %cst_141 {dimension_numbers = #tpu.dot_dimension_numbers<[1], [1], [0], [0], [0, 0, 1, 0], [], []>} : vector<16x32xbf16>, vector<128x32xbf16>, vector<16x128xf32> -> vector<16x128xf32>
    %364 = vector.broadcast %222 : vector<1x128xf32> to vector<16x128xf32>
    %365 = arith.addf %363, %364 : vector<16x128xf32>
    %cst_142 = arith.constant 5.000000e-01 : f32
    %366 = vector.broadcast %cst_142 : f32 to vector<16x128xf32>
    %367 = arith.mulf %366, %365 : vector<16x128xf32>
    %cst_143 = arith.constant 0.707106769 : f32
    %368 = vector.broadcast %cst_143 : f32 to vector<16x128xf32>
    %369 = arith.mulf %365, %368 : vector<16x128xf32>
    %370 = math.absf %369 : vector<16x128xf32>
    %cst_144 = arith.constant 0.327591091 : f32
    %371 = vector.broadcast %cst_144 : f32 to vector<16x128xf32>
    %372 = arith.mulf %371, %370 : vector<16x128xf32>
    %cst_145 = arith.constant 1.000000e+00 : f32
    %373 = vector.broadcast %cst_145 : f32 to vector<16x128xf32>
    %374 = arith.addf %373, %372 : vector<16x128xf32>
    %cst_146 = arith.constant 1.000000e+00 : f32
    %375 = vector.broadcast %cst_146 : f32 to vector<16x128xf32>
    %376 = arith.divf %375, %374 : vector<16x128xf32>
    %cst_147 = arith.constant 1.06140542 : f32
    %377 = vector.broadcast %cst_147 : f32 to vector<16x128xf32>
    %378 = arith.mulf %377, %376 : vector<16x128xf32>
    %cst_148 = arith.constant -1.45315206 : f32
    %379 = vector.broadcast %cst_148 : f32 to vector<16x128xf32>
    %380 = arith.addf %378, %379 : vector<16x128xf32>
    %381 = arith.mulf %380, %376 : vector<16x128xf32>
    %cst_149 = arith.constant 1.42141378 : f32
    %382 = vector.broadcast %cst_149 : f32 to vector<16x128xf32>
    %383 = arith.addf %381, %382 : vector<16x128xf32>
    %384 = arith.mulf %383, %376 : vector<16x128xf32>
    %cst_150 = arith.constant -0.284496725 : f32
    %385 = vector.broadcast %cst_150 : f32 to vector<16x128xf32>
    %386 = arith.addf %384, %385 : vector<16x128xf32>
    %387 = arith.mulf %386, %376 : vector<16x128xf32>
    %cst_151 = arith.constant 0.254829586 : f32
    %388 = vector.broadcast %cst_151 : f32 to vector<16x128xf32>
    %389 = arith.addf %387, %388 : vector<16x128xf32>
    %390 = arith.mulf %389, %376 : vector<16x128xf32>
    %391 = arith.mulf %370, %370 : vector<16x128xf32>
    %cst_152 = arith.constant 0.000000e+00 : f32
    %392 = vector.broadcast %cst_152 : f32 to vector<16x128xf32>
    %393 = arith.subf %392, %391 : vector<16x128xf32>
    %394 = math.exp %393 : vector<16x128xf32>
    %395 = arith.mulf %390, %394 : vector<16x128xf32>
    %cst_153 = arith.constant 1.000000e+00 : f32
    %396 = vector.broadcast %cst_153 : f32 to vector<16x128xf32>
    %397 = arith.subf %396, %395 : vector<16x128xf32>
    %cst_154 = arith.constant 0.000000e+00 : f32
    %398 = vector.broadcast %cst_154 : f32 to vector<16x128xf32>
    %399 = arith.cmpf oge, %369, %398 : vector<16x128xf32>
    %cst_155 = arith.constant 0.000000e+00 : f32
    %400 = vector.broadcast %cst_155 : f32 to vector<16x128xf32>
    %401 = arith.subf %400, %397 : vector<16x128xf32>
    %402 = arith.select %399, %397, %401 : vector<16x128xi1>, vector<16x128xf32>
    %cst_156 = arith.constant 1.000000e+00 : f32
    %403 = vector.broadcast %cst_156 : f32 to vector<16x128xf32>
    %404 = arith.addf %403, %402 : vector<16x128xf32>
    %405 = arith.mulf %367, %404 : vector<16x128xf32>
    %c1_157 = arith.constant 1 : index
    %c0_158 = arith.constant 0 : index
    %c0_159 = arith.constant 0 : index
    %406 = vector.load %arg8[%c1_157, %c0_158, %c0_159] : memref<2x32x128xbf16, #tpu.memory_space<vmem>>, vector<1x32x128xbf16>
    %407 = vector.shape_cast %406 : vector<1x32x128xbf16> to vector<32x128xbf16>
    %408 = arith.truncf %405 : vector<16x128xf32> to vector<16x128xbf16>
    %cst_160 = arith.constant dense<0.000000e+00> : vector<16x32xf32>
    %409 = tpu.matmul %408, %407, %cst_160 {dimension_numbers = #tpu.dot_dimension_numbers<[1], [1], [0], [0], [0, 0, 1, 0], [], []>} : vector<16x128xbf16>, vector<32x128xbf16>, vector<16x32xf32> -> vector<16x32xf32>
    %410 = vector.broadcast %223 : vector<1x32xf32> to vector<16x32xf32>
    %411 = arith.addf %409, %410 : vector<16x32xf32>
    %412 = arith.addf %337, %411 : vector<16x32xf32>
    %c2 = arith.constant 2 : index
    %c0_161 = arith.constant 0 : index
    %413 = vector.load %arg4[%c2, %c0_161] : memref<3x416xf32, #tpu.memory_space<vmem>>, vector<1x32xf32>
    %c2_162 = arith.constant 2 : index
    %c32_163 = arith.constant 32 : index
    %414 = vector.load %arg4[%c2_162, %c32_163] : memref<3x416xf32, #tpu.memory_space<vmem>>, vector<1x32xf32>
    %cst_164 = arith.constant dense<0.000000e+00> : vector<16xf32>
    %415 = vector.multi_reduction <add>, %412, %cst_164 [1] : vector<16x32xf32> to vector<16xf32>
    %416 = vector.shape_cast %415 : vector<16xf32> to vector<16x1xf32>
    %cst_165 = arith.constant 3.200000e+01 : f32
    %417 = vector.broadcast %cst_165 : f32 to vector<16x1xf32>
    %418 = arith.divf %416, %417 : vector<16x1xf32>
    %419 = vector.broadcast %418 : vector<16x1xf32> to vector<16x32xf32>
    %420 = arith.subf %412, %419 : vector<16x32xf32>
    %421 = arith.mulf %420, %420 : vector<16x32xf32>
    %cst_166 = arith.constant dense<0.000000e+00> : vector<16xf32>
    %422 = vector.multi_reduction <add>, %421, %cst_166 [1] : vector<16x32xf32> to vector<16xf32>
    %423 = vector.shape_cast %422 : vector<16xf32> to vector<16x1xf32>
    %cst_167 = arith.constant 3.200000e+01 : f32
    %424 = vector.broadcast %cst_167 : f32 to vector<16x1xf32>
    %425 = arith.divf %423, %424 : vector<16x1xf32>
    %426 = vector.broadcast %418 : vector<16x1xf32> to vector<16x32xf32>
    %427 = arith.subf %412, %426 : vector<16x32xf32>
    %cst_168 = arith.constant 9.99999974E-6 : f32
    %428 = vector.broadcast %cst_168 : f32 to vector<16x1xf32>
    %429 = arith.addf %425, %428 : vector<16x1xf32>
    %430 = math.rsqrt %429 : vector<16x1xf32>
    %431 = vector.broadcast %430 : vector<16x1xf32> to vector<16x32xf32>
    %432 = arith.mulf %427, %431 : vector<16x32xf32>
    %433 = vector.broadcast %413 : vector<1x32xf32> to vector<16x32xf32>
    %434 = arith.mulf %432, %433 : vector<16x32xf32>
    %435 = vector.broadcast %414 : vector<1x32xf32> to vector<16x32xf32>
    %436 = arith.addf %434, %435 : vector<16x32xf32>
    %c0_169 = arith.constant 0 : index
    %c0_170 = arith.constant 0 : index
    %437 = vector.load %arg9[%c0_169, %c0_170] : memref<128x32xbf16, #tpu.memory_space<vmem>>, vector<128x32xbf16>
    %438 = arith.truncf %436 : vector<16x32xf32> to vector<16x32xbf16>
    %cst_171 = arith.constant dense<0.000000e+00> : vector<16x128xf32>
    %439 = tpu.matmul %438, %437, %cst_171 {dimension_numbers = #tpu.dot_dimension_numbers<[1], [1], [0], [0], [0, 0, 1, 0], [], []>} : vector<16x32xbf16>, vector<128x32xbf16>, vector<16x128xf32> -> vector<16x128xf32>
    %c0_172 = arith.constant 0 : index
    %c0_173 = arith.constant 0 : index
    %440 = vector.load %arg10[%c0_172, %c0_173] : memref<16x128xf32, #tpu.memory_space<vmem>>, vector<16x128xf32>
    tpu.vector_store %arg10[%c0_172, %c0_173], %439 {strides = array<i32>} : memref<16x128xf32, #tpu.memory_space<vmem>>, vector<16x128xf32>,
    return
  }
  func.func @transform_0(%arg0: i32) -> (i32, i32) {
    %c0_i32 = arith.constant 0 : i32
    %c0_i32_0 = arith.constant 0 : i32
    return %arg0, %c0_i32 : i32, i32
  }
  func.func @transform_1(%arg0: i32) -> (i32, i32) {
    %c0_i32 = arith.constant 0 : i32
    %c0_i32_0 = arith.constant 0 : i32
    %c0_i32_1 = arith.constant 0 : i32
    return %c0_i32, %c0_i32_0 : i32, i32
  }
  func.func @transform_2(%arg0: i32) -> (i32, i32) {
    %c0_i32 = arith.constant 0 : i32
    %c0_i32_0 = arith.constant 0 : i32
    %c0_i32_1 = arith.constant 0 : i32
    return %c0_i32, %c0_i32_0 : i32, i32
  }
  func.func @transform_3(%arg0: i32) -> (i32, i32) {
    %c0_i32 = arith.constant 0 : i32
    %c0_i32_0 = arith.constant 0 : i32
    %c0_i32_1 = arith.constant 0 : i32
    return %c0_i32, %c0_i32_0 : i32, i32
  }
  func.func @transform_4(%arg0: i32) -> (i32, i32, i32) {
    %c0_i32 = arith.constant 0 : i32
    %c0_i32_0 = arith.constant 0 : i32
    %c0_i32_1 = arith.constant 0 : i32
    %c0_i32_2 = arith.constant 0 : i32
    return %c0_i32, %c0_i32_0, %c0_i32_1 : i32, i32, i32
  }
  func.func @transform_5(%arg0: i32) -> (i32, i32, i32) {
    %c0_i32 = arith.constant 0 : i32
    %c0_i32_0 = arith.constant 0 : i32
    %c0_i32_1 = arith.constant 0 : i32
    %c0_i32_2 = arith.constant 0 : i32
    return %c0_i32, %c0_i32_0, %c0_i32_1 : i32, i32, i32
  }
  func.func @transform_6(%arg0: i32) -> (i32, i32, i32) {
    %c0_i32 = arith.constant 0 : i32
    %c0_i32_0 = arith.constant 0 : i32
    %c0_i32_1 = arith.constant 0 : i32
    %c0_i32_2 = arith.constant 0 : i32
    return %c0_i32, %c0_i32_0, %c0_i32_1 : i32, i32, i32
  }
  func.func @transform_7(%arg0: i32) -> (i32, i32, i32) {
    %c0_i32 = arith.constant 0 : i32
    %c0_i32_0 = arith.constant 0 : i32
    %c0_i32_1 = arith.constant 0 : i32
    %c0_i32_2 = arith.constant 0 : i32
    return %c0_i32, %c0_i32_0, %c0_i32_1 : i32, i32, i32
  }
  func.func @transform_8(%arg0: i32) -> (i32, i32) {
    %c0_i32 = arith.constant 0 : i32
    %c0_i32_0 = arith.constant 0 : i32
    %c0_i32_1 = arith.constant 0 : i32
    return %c0_i32, %c0_i32_0 : i32, i32
  }
  func.func @transform_9(%arg0: i32) -> (i32, i32) {
    %c0_i32 = arith.constant 0 : i32
    %c0_i32_0 = arith.constant 0 : i32
    return %arg0, %c0_i32 : i32, i32
  }
}

</mosaic_0001>

<bundles_post_ra>
// kernel: gpt_forward.1
= control target key start
LH: loop header
LB: loop body
LE: loop exit
PB: predicated region body
PF: predicated region fallthrough
CT: control target
= control target key end

     0   :  { %v3335_v1 = vmov 0   ;;  %v3336_v2 = vmov 0.0   ;;  %vm3337_vm0 = vmmov 0   ;;  %s3988_s0 = inlined_call_operand.vmem [shape: s32[16,1], index: 0, kind: input, shape index: {}]   ;;  %s3989_s1 = inlined_call_operand.vmem [shape: bf16[64,32], index: 1, kind: input, shape index: {}]   ;;  %s3990_s2 = inlined_call_operand.vmem [shape: f32[8,32], index: 2, kind: input, shape index: {}]   ;;  %s3991_s3 = inlined_call_operand.vmem [shape: f32[3,416], index: 3, kind: input, shape index: {}]   ;;  %s3992_s4 = inlined_call_operand.vmem [shape: bf16[2,96,32], index: 4, kind: input, shape index: {}]   ;;  %s3993_s5 = inlined_call_operand.vmem [shape: bf16[2,32,32], index: 5, kind: input, shape index: {}]   ;;  %s3994_s6 = inlined_call_operand.vmem [shape: bf16[2,128,32], index: 6, kind: input, shape index: {}]   ;;  %s3995_s7 = inlined_call_operand.vmem [shape: bf16[2,32,128], index: 7, kind: input, shape index: {}]   ;;  %s3996_s8 = inlined_call_operand.vmem [shape: bf16[128,32], index: 8, kind: input, shape index: {}]   ;;  %s3997_s9 = inlined_call_operand.hbm [shape: f32[16,128], index: 9, kind: output, shape index: {}]  }
   0x1   :  { %v34_v0 = vld [vmem:[%s3988_s0] sm:$0xff]  ;;  %3184 = vset.pattern.permute.xlu0 %v3335_v1  ;;  %2955 = vmatprep.subr.bf16.mxu0 %v3336_v2  ;;  %v35_v4 = vld [vmem:[%s3988_s0 + $0x8] sm:$0xff]  ;;  %v3197_v6 = vld [vmem:[%s3989_s1 + $0x10] sm:$0xff]  }
   0x2   :  { %v3195_v3 = vld [vmem:[%s3989_s1] sm:$0xff]   ;;  %39 = vperm.xlu0 %3184, %v34_v0   ;;  %v3196_v5 = vld [vmem:[%s3989_s1 + $0x8] sm:$0xff]   ;;  %2967 = vmatprep.subr.bf16.mxu1 %v3336_v2  ;;  %v3198_v7 = vld [vmem:[%s3989_s1 + $0x18] sm:$0xff]  }
   0x3   :  { %2956 = vmatpush3.bf16.msra.mxu0 %v3195_v3  ;;  %2963 = vmatprep.mubr.msk.bf16.mxu0 %vm3337_vm0, %v3336_v2 }
   0x4   :  { %2957 = vmatprep.subr.bf16.mxu0 %v3336_v2  ;;  %2979 = vmatprep.mubr.msk.bf16.mxu1 %vm3337_vm0, %v3336_v2 }
   0x6   :  { %42 = vperm.xlu0 %3184, %v35_v4  }
   0x7   :  { %2958 = vmatpush3.bf16.msra.mxu0 %v3196_v5 }
   0x8   :  { %2959 = vmatprep.subr.bf16.mxu0 %v3336_v2 }
   0xb   :  { %2960 = vmatpush3.bf16.msra.mxu0 %v3197_v6 }
   0xc   :  { %2961 = vmatprep.subr.bf16.mxu0 %v3336_v2 }
   0xf   :  { %2962 = vmatpush3.bf16.msra.mxu0 %v3198_v7 }
  0x10   :  { %2983 = vmatprep.subr.mxu0 %v3336_v2 }
  0x11   :  { %14 = vsyncpa [#allocation3], 0  ;;  %v36_v8 = vlaneseq  ;;  %vm81_vm3 = vcmask 523264   ;;  %v126_v15 = vld [vmem:[%s3990_s2] sm:$0xff]  ;;  %vm137_vm4 = vcmask 261120   ;;  %v3200_v26 = vld [vmem:[%s3992_s4 + $0x8] sm:$0xff]  }
  0x12   :  { %v3199_v24 = vld [vmem:[%s3992_s4] sm:$0xff]   ;;  %v254_v27 = vsel %vm137_vm4, %v3200_v26, 0  ;;  %v3201_v28 = vld [vmem:[%s3992_s4 + $0x10] sm:$0xff]   ;;  %v3202_v40 = vld [vmem:[%s3992_s4 + $0x18] sm:$0xff]   ;;  %s3338_s30 = smov 96   ;;  %s3339_s16 = smov 64  }
  0x13   :  { %v3426_v9 = vand.u32 127, %v36_v8  ;;  %v251_v25 = vsel %vm137_vm4, %v3199_v24, 0  ;;  %v257_v29 = vsel %vm137_vm4, %v3201_v28, 0  ;;  %v260_v41 = vsel %vm137_vm4, %v3202_v40, 0  ;;  %v2745_v42 = vld [vmem:[%s3991_s3] ss:$0 sm:$0xff] }
  0x14   :  { %2968 = vmatpush3.bf16.xpose.msra.mxu1 %v251_v25  ;;  %v3203_v43 = vld [vmem:[%s3992_s4 + $0x20] sm:$0xff]   ;;  %v3204_v45 = vld [vmem:[%s3992_s4 + $0x28] sm:$0xff]   ;;  %v3483_v47 = vshrl.u32 %v36_v8, 7  ;;  %vm312_vm5 = vcmask 130048   ;;  %vm389_vm7 = vcmask 64512   ;;  %s3340_s17 = smov 80  }
  0x15   :  { %2969 = vmatprep.subr.bf16.mxu1 %v3336_v2  ;;  %v263_v44 = vsel %vm137_vm4, %v3203_v43, 0  ;;  %v266_v46 = vsel %vm137_vm4, %v3204_v45, 0  ;;  %v133_v49 = vld [vmem:[%s3991_s3] sm:$0x11]  ;;  %s3341_s18 = smov 112   ;;  %s3342_s19 = smov 48  }
  0x16   :  { %v3487_v48 = vsub.s32 0, %v3483_v47  ;;  %v197_v50 = vsub.s32 4, %v3483_v47  ;;  %vm3514_vm6 = vcmp.le.s32.totalorder %v3426_v9, %v3483_v47  ;;  %s3343_s22 = smov 16   ;;  %s3344_s1 = smov 32  }
  0x18   :  { %v194_v51 = vrot.slane %v133_v49, %v3487_v48  ;;  %v198_v52 = vrot.slane %v133_v49, %v197_v50 }
  0x1a   :  { %v204_v53 = vrot.slane %v194_v51, %v3487_v48  ;;  %v208_v54 = vrot.slane %v198_v52, %v3487_v48 }
  0x1c   :  { %2970 = vmatpush3.bf16.xpose.msra.mxu1 %v254_v27 }
  0x1d   :  { %2971 = vmatprep.subr.bf16.mxu1 %v3336_v2 }
  0x24   :  { %2972 = vmatpush3.bf16.xpose.msra.mxu1 %v257_v29 }
  0x25   :  { %2973 = vmatprep.subr.bf16.mxu1 %v3336_v2 }
  0x2c   :  { %2974 = vmatpush3.bf16.xpose.msra.mxu1 %v260_v41 }
  0x2d   :  { %2975 = vmatprep.subr.bf16.mxu1 %v3336_v2 }
  0x34   :  { %2976 = vmatpush3.bf16.xpose.msra.mxu1 %v263_v44 }
  0x35   :  { %2977 = vmatprep.subr.bf16.mxu1 %v3336_v2 }
  0x3c   :  { %2978 = vmatpush3.bf16.xpose.msra.mxu1 %v266_v46 }
  0x3d   :  { %3051 = vmatprep.subr.bf16.mxu1 %v3336_v2 }
  0x81   :  { %v40_v10 = vpop.permute.xlu0 %39 }
  0x82   :  { %vm44_vm1 = vcmp.eq.s32.totalorder %v40_v10, %v3426_v9 }
  0x83   :  { %v46_v12 = vsel %vm44_vm1, 1.0, %v3336_v2 }
  0x85   :  { %v43_v11 = vpop.permute.xlu0 %42 }
  0x86   :  { %vm45_vm2 = vcmp.eq.s32.totalorder %v43_v11, %v3426_v9 }
  0x87   :  { %v47_v13 = vsel %vm45_vm2, 1.0, %v3336_v2 }
  0x88   :  { %v48_v14 = vpack.c.bf16 %v47_v13, %v46_v12 }
  0x8a   :  { %2964 = vmatmul.mubr.msk.bf16.vlgmr.msra.gmra.mrb[0].mxu0 %vm81_vm3, %v48_v14 }
  0x8b   :  { %2985 = vmatprep.mubr.msk.f32.mxu0 %vm3337_vm0, %v3336_v2 }
 0x15d   :  { %v119_v16 = vpop.f32.mrb[0].mxu0 }
 0x15e   :  { %v3438_v17 = vadd.f32 %v126_v15, %v119_v16  ;;  %v2965_v18 = vpop.f32.mrb[1].mxu0 }
 0x15f   :  { %v122_v19 = vpop.f32.mrb[2].mxu0 }
 0x160   :  { %v3440_v20 = vadd.f32 %v126_v15, %v122_v19  ;;  %v2966_v21 = vpop.f32.mrb[3].mxu0  ;;  %v138_v22 = vsel %vm137_vm4, %v3438_v17, 0.0 }
 0x161   :  { %139 = vadd.xlane.f32.xlu1 %v138_v22 }
 0x162   :  { %v141_v23 = vsel %vm137_vm4, %v3440_v20, 0.0 }
 0x165   :  { %142 = vadd.xlane.f32.xlu1 %v141_v23 }
 0x1ee   :  { %v140_v30 = vpop.xlane.xlu1 %139 }
 0x1ef   :  { %v145_v31 = vmul.f32 0.03125, %v140_v30 }
 0x1f1   :  { %v147_v32 = vsub.f32 %v3438_v17, %v145_v31 }
 0x1f2   :  { %v143_v33 = vpop.xlane.xlu1 %142 }
 0x1f3   :  { %v146_v34 = vmul.f32 0.03125, %v143_v33  ;;  %v149_v35 = vmul.f32 %v147_v32, %v147_v32 }
 0x1f5   :  { %v148_v36 = vsub.f32 %v3440_v20, %v146_v34  ;;  %v151_v37 = vsel %vm137_vm4, %v149_v35, 0.0 }
 0x1f6   :  { %152 = vadd.xlane.f32.xlu0 %v151_v37 }
 0x1f7   :  { %v150_v38 = vmul.f32 %v148_v36, %v148_v36 }
 0x1f9   :  { %v154_v39 = vsel %vm137_vm4, %v150_v38, 0.0 }
 0x1fa   :  { %155 = vadd.xlane.f32.xlu1 %v154_v39 }
 0x20b   :  { %172 = vrot.lane.b32.xlu1 %v2745_v42, %s3338_s30 }
 0x20f   :  { %241 = vrot.lane.b32.xlu1 %v204_v53, %s3339_s16 }
 0x213   :  { %243 = vrot.lane.b32.xlu1 %v208_v54, %s3339_s16 }
 0x283   :  { %v153_v55 = vpop.xlane.xlu0 %152 }
 0x284   :  { %v157_v56 = vmul.f32 0.03125, %v153_v55 }
 0x286   :  { %v159_v57 = vadd.f32 1e-05, %v157_v56 }
 0x287   :  { %v156_v58 = vpop.xlane.xlu1 %155 }
 0x288   :  { %3243 = vrsqrt.f32 %v159_v57  ;;  %v158_v59 = vmul.f32 0.03125, %v156_v58 }
 0x28a   :  { %v160_v60 = vadd.f32 1e-05, %v158_v59 }
 0x28b   :  { %v173_v3 = vpop.permute.xlu1 %172 }
 0x28c   :  { %3245 = vrsqrt.f32 %v160_v60 }
 0x28f   :  { %v242_v8 = vpop.permute.xlu1 %241 }
 0x292   :  { %v3244_v61 = vpop.eup %3243 }
 0x293   :  { %v163_v62 = vmul.f32 %v3244_v61, %v147_v32  ;;  %v244_v10 = vpop.permute.xlu1 %243 }
 0x294   :  { %v245_v11 = vsel %vm81_vm3, %v242_v8, %v244_v10 }
 0x295   :  { %v169_v1 = vmul.f32 %v2745_v42, %v163_v62 }
 0x296   :  { %v3246_v63 = vpop.eup %3245 }
 0x297   :  { %v164_v0 = vmul.f32 %v3246_v63, %v148_v36  ;;  %v175_v5 = vadd.f32 %v173_v3, %v169_v1 }
 0x299   :  { %v170_v4 = vmul.f32 %v2745_v42, %v164_v0 }
 0x29b   :  { %v176_v6 = vadd.f32 %v173_v3, %v170_v4 }
 0x29d   :  { %v189_v7 = vpack.c.bf16 %v176_v6, %v175_v5 }
 0x29f   :  { %2980 = vmatmul.mubr.msk.bf16.vlgmr.msra.gmra.mrb[0].mxu1 %vm137_vm4, %v189_v7 }
 0x2a0   :  { %3055 = vmatprep.mubr.msk.bf16.mxu1 %vm3337_vm0, %v3336_v2 }
 0x372   :  { %v302_v12 = vpop.f32.mrb[0].mxu1 }
 0x373   :  { %v303_v13 = vadd.f32 %v302_v12, %v245_v11  ;;  %v2981_v14 = vpop.f32.mrb[1].mxu1 }
 0x374   :  { %v305_v15 = vpop.f32.mrb[2].mxu1 }
 0x375   :  { %v3504_v16 = vadd.f32 %v305_v15, %v245_v11  ;;  %v2982_v18 = vpop.f32.mrb[3].mxu1  ;;  %310 = vrot.lane.b32.xlu1 %v303_v13, %s3338_s30 }
 0x3e7   :  { %v311_v19 = vpop.permute.xlu1 %310 }
 0x3e8   :  { %2984 = vmatpush3.xpose.msk.msra.mxu0 %vm312_vm5, %v311_v19 }
 0x3e9   :  { %2988 = vmatprep.subr.mxu0 %v3336_v2 }
 0x3eb   :  { %2986 = vmatmul.mubr.msk.f32.vlgmr.msra.gmra.mrb[4].mxu0 %vm312_vm5, %v303_v13 }
 0x3ec   :  { %2990 = vmatprep.mubr.msk.f32.mxu0 %vm3337_vm0, %v3336_v2 }
 0x4be   :  { %v383_v22 = vpop.f32.mrb[4].mxu0 }
 0x4bf   :  { %v387_v23 = vmul.f32 0.25, %v383_v22  ;;  %v2987_v24 = vpop.f32.mrb[5].mxu0 }
 0x4c1   :  { %v388_v25 = vsel %vm3514_vm6, %v387_v23, -1e+30 }
 0x4c2   :  { %v390_v26 = vsel %vm389_vm7, %v388_v25, -inf }
 0x4c3   :  { %391 = vmax.xlane.f32.xlu0 %v390_v26 }
 0x4d9   :  { %401 = vrot.lane.b32.xlu0 %v303_v13, %s3339_s16 }
 0x4dd   :  { %479 = vrot.lane.b32.xlu0 %v303_v13, %s3340_s17 }
 0x4e1   :  { %477 = vrot.lane.b32.xlu0 %v303_v13, %s3341_s18 }
 0x550   :  { %v392_v9 = vpop.xlane.xlu0 %391 }
 0x551   :  { %v393_v27 = vsub.f32 %v388_v25, %v392_v9 }
 0x553   :  { %v394_v28 = vmul.f32 1.442695, %v393_v27 }
 0x554   :  { %v402_v29 = vpop.permute.xlu0 %401 }
 0x555   :  { %3247 = vpow2.f32 %v394_v28  ;;  %2989 = vmatpush3.msra.mxu0 %v402_v29 }
 0x556   :  { %2993 = vmatprep.subr.mxu0 %v3336_v2 }
 0x558   :  { %v480_v34 = vpop.permute.xlu0 %479 }
 0x55c   :  { %v478_v36 = vpop.permute.xlu0 %477 }
 0x55f   :  { %v3248_v30 = vpop.eup %3247 }
 0x560   :  { %v396_v31 = vsel %vm389_vm7, %v3248_v30, 0.0 }
 0x561   :  { %397 = vadd.xlane.f32.xlu1 %v396_v31 }
 0x572   :  { %568 = vrot.lane.b32.xlu1 %v303_v13, %s3342_s19 }
 0x5ee   :  { %v398_v32 = vpop.xlane.xlu1 %397 }
 0x5ef   :  { %3249 = vrcp.f32 %v398_v32  ;;  %v3205_v32 = vld [vmem:[%s3993_s5] sm:$0xff]  }
 0x5f2   :  { %v569_v37 = vpop.permute.xlu1 %568 }
 0x5f9   :  { %v3250_v33 = vpop.eup %3249 }
 0x5fa   :  { %v400_v35 = vmul.f32 %v3250_v33, %v3248_v30  ;;  %v1014_v33 = vsel %vm137_vm4, %v3205_v32, 0 }
 0x5fc   :  { %2991 = vmatmul.mubr.msk.f32.vlgmr.msra.gmra.mrb[6].mxu0 %vm389_vm7, %v400_v35 }
 0x5fd   :  { %2994 = vmatpush3.xpose.msk.msra.mxu0 %vm312_vm5, %v480_v34  ;;  %2995 = vmatprep.mubr.msk.f32.mxu0 %vm3337_vm0, %v3336_v2 }
 0x5fe   :  { %2998 = vmatprep.subr.mxu0 %v3336_v2 }
 0x600   :  { %2996 = vmatmul.mubr.msk.f32.vlgmr.msra.gmra.mrb[8].mxu0 %vm312_vm5, %v478_v36 }
 0x601   :  { %2999 = vmatpush3.msra.mxu0 %v569_v37  ;;  %3000 = vmatprep.mubr.msk.f32.mxu0 %vm3337_vm0, %v3336_v2 }
 0x602   :  { %3003 = vmatprep.subr.mxu0 %v3336_v2 }
 0x6cf   :  { %v3536_v38 = vpop.f32.mrb[6].mxu0 }
 0x6d0   :  { %v2992_v39 = vpop.f32.mrb[7].mxu0 }
 0x6d1   :  { %v3599_v39 = vld [vmem:[%s3991_s3 + $0x4] ss:$0 sm:$0xff] }
 0x6d3   :  { %v551_v40 = vpop.f32.mrb[8].mxu0 }
 0x6d4   :  { %v555_v41 = vmul.f32 0.25, %v551_v40  ;;  %v2997_v42 = vpop.f32.mrb[9].mxu0 }
 0x6d6   :  { %v556_v43 = vsel %vm3514_vm6, %v555_v41, -1e+30 }
 0x6d7   :  { %v557_v44 = vsel %vm389_vm7, %v556_v43, -inf }
 0x6d8   :  { %558 = vmax.xlane.f32.xlu0 %v557_v44 }
 0x6ee   :  { %739 = vrot.lane.b32.xlu0 %v3504_v16, %s3339_s16 }
 0x6f2   :  { %817 = vrot.lane.b32.xlu0 %v3504_v16, %s3340_s17 }
 0x765   :  { %v559_v45 = vpop.xlane.xlu0 %558 }
 0x766   :  { %v560_v46 = vsub.f32 %v556_v43, %v559_v45 }
 0x768   :  { %v561_v49 = vmul.f32 1.442695, %v560_v46 }
 0x769   :  { %v740_v57 = vpop.permute.xlu0 %739 }
 0x76a   :  { %3251 = vpow2.f32 %v561_v49 }
 0x76d   :  { %v818_v7 = vpop.permute.xlu0 %817 }
 0x774   :  { %v3252_v51 = vpop.eup %3251 }
 0x775   :  { %v563_v52 = vsel %vm389_vm7, %v3252_v51, 0.0 }
 0x776   :  { %564 = vadd.xlane.f32.xlu1 %v563_v52 }
 0x787   :  { %650 = vrot.lane.b32.xlu1 %v3504_v16, %s3338_s30 }
 0x803   :  { %v565_v53 = vpop.xlane.xlu1 %564 }
 0x804   :  { %3253 = vrcp.f32 %v565_v53 }
 0x807   :  { %v651_v56 = vpop.permute.xlu1 %650 }
 0x80e   :  { %v3254_v54 = vpop.eup %3253 }
 0x80f   :  { %v567_v55 = vmul.f32 %v3254_v54, %v3252_v51 }
 0x811   :  { %3001 = vmatmul.mubr.msk.f32.vlgmr.msra.gmra.mrb[10].mxu0 %vm389_vm7, %v567_v55 }
 0x812   :  { %3004 = vmatpush3.xpose.msk.msra.mxu0 %vm312_vm5, %v651_v56  ;;  %3005 = vmatprep.mubr.msk.f32.mxu0 %vm3337_vm0, %v3336_v2 }
 0x813   :  { %3008 = vmatprep.subr.mxu0 %v3336_v2 }
 0x815   :  { %3006 = vmatmul.mubr.msk.f32.vlgmr.msra.gmra.mrb[12].mxu0 %vm312_vm5, %v3504_v16 }
 0x816   :  { %3009 = vmatpush3.msra.mxu0 %v740_v57  ;;  %3010 = vmatprep.mubr.msk.f32.mxu0 %vm3337_vm0, %v3336_v2 }
 0x817   :  { %3013 = vmatprep.subr.mxu0 %v3336_v2 }
 0x8e4   :  { %v3558_v58 = vpop.f32.mrb[10].mxu0 }
 0x8e5   :  { %v3002_v59 = vpop.f32.mrb[11].mxu0 }
 0x8e6   :  { %v3207_v59 = vld [vmem:[%s3994_s6] sm:$0xff]  }
 0x8e8   :  { %v722_v60 = vpop.f32.mrb[12].mxu0 }
 0x8e9   :  { %v726_v61 = vmul.f32 0.25, %v722_v60  ;;  %v3007_v62 = vpop.f32.mrb[13].mxu0 }
 0x8eb   :  { %v727_v63 = vsel %vm3514_vm6, %v726_v61, -1e+30  ;;  %v3209_v61 = vld [vmem:[%s3994_s6 + $0x10] sm:$0xff]  }
 0x8ec   :  { %v728_v0 = vsel %vm389_vm7, %v727_v63, -inf  ;;  %v1169_v62 = vsel %vm137_vm4, %v3209_v61, 0 }
 0x8ed   :  { %729 = vmax.xlane.f32.xlu1 %v728_v0 }
 0x97a   :  { %v730_v1 = vpop.xlane.xlu1 %729 }
 0x97b   :  { %v731_v3 = vsub.f32 %v727_v63, %v730_v1  ;;  %v3210_v63 = vld [vmem:[%s3994_s6 + $0x18] sm:$0xff]   ;;  %v3211_v1 = vld [vmem:[%s3994_s6 + $0x20] sm:$0xff]  }
 0x97c   :  { %v1172_v0 = vsel %vm137_vm4, %v3210_v63, 0 }
 0x97d   :  { %v732_v4 = vmul.f32 1.442695, %v731_v3  ;;  %v1175_v3 = vsel %vm137_vm4, %v3211_v1, 0 }
 0x97f   :  { %3255 = vpow2.f32 %v732_v4 }
 0x989   :  { %v3256_v5 = vpop.eup %3255 }
 0x98a   :  { %v734_v6 = vsel %vm389_vm7, %v3256_v5, 0.0 }
 0x98b   :  { %735 = vadd.xlane.f32.xlu0 %v734_v6 }
 0x9a1   :  { %815 = vrot.lane.b32.xlu0 %v3504_v16, %s3341_s18 }
 0xa18   :  { %v736_v8 = vpop.xlane.xlu0 %735 }
 0xa19   :  { %3257 = vrcp.f32 %v736_v8 }
 0xa1c   :  { %v816_v12 = vpop.permute.xlu0 %815 }
 0xa23   :  { %v3258_v10 = vpop.eup %3257 }
 0xa24   :  { %v738_v11 = vmul.f32 %v3258_v10, %v3256_v5 }
 0xa26   :  { %3011 = vmatmul.mubr.msk.f32.vlgmr.msra.gmra.mrb[14].mxu0 %vm389_vm7, %v738_v11 }
 0xa27   :  { %3014 = vmatpush3.xpose.msk.msra.mxu0 %vm312_vm5, %v818_v7  ;;  %3015 = vmatprep.mubr.msk.f32.mxu0 %vm3337_vm0, %v3336_v2 }
 0xa28   :  { %3018 = vmatprep.subr.mxu0 %v3336_v2 }
 0xa2a   :  { %3016 = vmatmul.mubr.msk.f32.vlgmr.msra.gmra.mrb[16].mxu0 %vm312_vm5, %v816_v12 }
 0xa2b   :  { %3020 = vmatprep.mubr.msk.f32.mxu0 %vm3337_vm0, %v3336_v2 }
 0xaf9   :  { %v811_v13 = vpop.f32.mrb[14].mxu0 }
 0xafa   :  { %v3012_v14 = vpop.f32.mrb[15].mxu0 }
 0xafd   :  { %v889_v15 = vpop.f32.mrb[16].mxu0 }
 0xafe   :  { %v893_v18 = vmul.f32 0.25, %v889_v15  ;;  %v3017_v19 = vpop.f32.mrb[17].mxu0  ;;  %v3212_v15 = vld [vmem:[%s3994_s6 + $0x28] sm:$0xff]  }
 0xaff   :  { %v3213_v19 = vld [vmem:[%s3994_s6 + $0x30] sm:$0xff]  }
 0xb00   :  { %v894_v22 = vsel %vm3514_vm6, %v893_v18, -1e+30  ;;  %v1178_v18 = vsel %vm137_vm4, %v3212_v15, 0 }
 0xb01   :  { %v895_v23 = vsel %vm389_vm7, %v894_v22, -inf }
 0xb02   :  { %896 = vmax.xlane.f32.xlu0 %v895_v23  ;;  %v3214_v23 = vld [vmem:[%s3994_s6 + $0x38] sm:$0xff]  }
 0xb8f   :  { %v897_v24 = vpop.xlane.xlu0 %896 }
 0xb90   :  { %v898_v25 = vsub.f32 %v894_v22, %v897_v24  ;;  %v1181_v22 = vsel %vm137_vm4, %v3213_v19, 0  ;;  %v1184_v24 = vsel %vm137_vm4, %v3214_v23, 0 }
 0xb92   :  { %v899_v26 = vmul.f32 1.442695, %v898_v25 }
 0xb94   :  { %3259 = vpow2.f32 %v899_v26 }
 0xb9e   :  { %v3260_v9 = vpop.eup %3259 }
 0xb9f   :  { %v901_v27 = vsel %vm389_vm7, %v3260_v9, 0.0 }
 0xba0   :  { %902 = vadd.xlane.f32.xlu1 %v901_v27 }
 0xbb1   :  { %906 = vrot.lane.b32.xlu1 %v3504_v16, %s3342_s19  ;;  %v3206_v16 = vld [vmem:[%s3993_s5 + $0x8] sm:$0xff]  }
 0xbb2   :  { %v1017_v34 = vsel %vm137_vm4, %v3206_v16, 0 }
 0xc2d   :  { %v903_v28 = vpop.xlane.xlu1 %902 }
 0xc2e   :  { %3261 = vrcp.f32 %v903_v28 }
 0xc31   :  { %v907_v29 = vpop.permute.xlu1 %906 }
 0xc32   :  { %3019 = vmatpush3.msra.mxu0 %v907_v29 }
 0xc33   :  { %3023 = vmatprep.subr.bf16.mxu0 %v3336_v2 }
 0xc38   :  { %v3262_v30 = vpop.eup %3261 }
 0xc39   :  { %v905_v31 = vmul.f32 %v3262_v30, %v3260_v9 }
 0xc3b   :  { %3021 = vmatmul.mubr.msk.f32.vlgmr.msra.gmra.mrb[18].mxu0 %vm389_vm7, %v905_v31 }
 0xc3c   :  { %3027 = vmatprep.mubr.msk.bf16.mxu0 %vm3337_vm0, %v3336_v2  ;;  %3024 = vmatpush3.bf16.xpose.msra.mxu0 %v1014_v33 }
 0xc3d   :  { %3025 = vmatprep.subr.bf16.mxu0 %v3336_v2 }
 0xc44   :  { %3026 = vmatpush3.bf16.xpose.msra.mxu0 %v1017_v34 }
 0xc45   :  { %3031 = vmatprep.subr.bf16.mxu0 %v3336_v2 }
 0xd0e   :  { %v978_v35 = vpop.f32.mrb[18].mxu0 }
 0xd0f   :  { %v3185_v36 = vpack.i.bf16 %v978_v35, %v3558_v58  ;;  %v3022_v37 = vpop.f32.mrb[19].mxu0 }
 0xd11   :  { %3186 = vrot.lane.b32.xlu1 %v3185_v36, %s3343_s22 }
 0xd15   :  { %1007 = vrot.lane.b32.xlu1 %v3599_v39, %s3338_s30 }
 0xd83   :  { %v3187_v40 = vpop.permute.xlu1 %3186 }
 0xd84   :  { %v3189_v41 = vunpack.i.h.bf16 %v3187_v40  ;;  %v3188_v42 = vunpack.i.l.bf16 %v3187_v40 }
 0xd86   :  { %v986_v43 = vsel %vm312_vm5, %v811_v13, %v3189_v41  ;;  %v648_v44 = vsel %vm312_vm5, %v3536_v38, %v3188_v42  ;;  %v3215_v41 = vld [vmem:[%s3995_s7] sm:$0xff]   ;;  %v3216_v42 = vld [vmem:[%s3995_s7 + $0x8] sm:$0xff]  }
 0xd87   :  { %v991_v45 = vpack.c.bf16 %v986_v43, %v648_v44  ;;  %v1008_v46 = vpop.permute.xlu1 %1007  ;;  %3052 = vmatpush3.bf16.xpose.msra.mxu1 %v3215_v41  ;;  %v2769_v43 = vld [vmem:[%s3991_s3 + $0x8] ss:$0 sm:$0xff] }
 0xd88   :  { %3053 = vmatprep.subr.bf16.mxu1 %v3336_v2 }
 0xd89   :  { %3028 = vmatmul.mubr.msk.bf16.vlgmr.msra.gmra.mrb[20].mxu0 %vm137_vm4, %v991_v45 }
 0xd8a   :  { %3047 = vmatprep.mubr.msk.bf16.mxu0 %vm3337_vm0, %v3336_v2 }
 0xd8f   :  { %3054 = vmatpush3.bf16.xpose.msra.mxu1 %v3216_v42 }
 0xd90   :  { %3059 = vmatprep.subr.bf16.mxu1 %v3336_v2 }
 0xe5c   :  { %v1053_v49 = vpop.f32.mrb[20].mxu0 }
 0xe5d   :  { %v1054_v51 = vadd.f32 %v1053_v49, %v1008_v46  ;;  %v3029_v52 = vpop.f32.mrb[21].mxu0 }
 0xe5e   :  { %v1056_v53 = vpop.f32.mrb[22].mxu0 }
 0xe5f   :  { %v3610_v54 = vadd.f32 %v1054_v51, %v3438_v17  ;;  %v1057_v55 = vadd.f32 %v1056_v53, %v1008_v46  ;;  %v3030_v56 = vpop.f32.mrb[23].mxu0  ;;  %v1163_v17 = vsel %vm137_vm4, %v3207_v59, 0 }
 0xe60   :  { %3032 = vmatpush3.bf16.xpose.msra.mxu0 %v1163_v17 }
 0xe61   :  { %v3613_v57 = vadd.f32 %v1057_v55, %v3440_v20  ;;  %v1062_v38 = vsel %vm137_vm4, %v3610_v54, 0.0  ;;  %3033 = vmatprep.subr.bf16.mxu0 %v3336_v2  ;;  %v3208_v20 = vld [vmem:[%s3994_s6 + $0x8] sm:$0xff]  }
 0xe62   :  { %1063 = vadd.xlane.f32.xlu1 %v1062_v38  ;;  %v1166_v60 = vsel %vm137_vm4, %v3208_v20, 0 }
 0xe63   :  { %v1065_v58 = vsel %vm137_vm4, %v3613_v57, 0.0 }
 0xe64   :  { %1066 = vadd.xlane.f32.xlu0 %v1065_v58 }
 0xe68   :  { %3034 = vmatpush3.bf16.xpose.msra.mxu0 %v1166_v60 }
 0xe69   :  { %3035 = vmatprep.subr.bf16.mxu0 %v3336_v2 }
 0xe70   :  { %3036 = vmatpush3.bf16.xpose.msra.mxu0 %v1169_v62 }
 0xe71   :  { %3037 = vmatprep.subr.bf16.mxu0 %v3336_v2 }
 0xe78   :  { %3038 = vmatpush3.bf16.xpose.msra.mxu0 %v1172_v0 }
 0xe79   :  { %3039 = vmatprep.subr.bf16.mxu0 %v3336_v2 }
 0xe80   :  { %3040 = vmatpush3.bf16.xpose.msra.mxu0 %v1175_v3 }
 0xe81   :  { %3041 = vmatprep.subr.bf16.mxu0 %v3336_v2 }
 0xe88   :  { %3042 = vmatpush3.bf16.xpose.msra.mxu0 %v1178_v18 }
 0xe89   :  { %3043 = vmatprep.subr.bf16.mxu0 %v3336_v2 }
 0xe90   :  { %3044 = vmatpush3.bf16.xpose.msra.mxu0 %v1181_v22 }
 0xe91   :  { %3045 = vmatprep.subr.bf16.mxu0 %v3336_v2 }
 0xe98   :  { %3046 = vmatpush3.bf16.xpose.msra.mxu0 %v1184_v24 }
 0xe99   :  { %3075 = vmatprep.subr.mxu0 %v3336_v2 }
 0xeef   :  { %v1064_v4 = vpop.xlane.xlu1 %1063 }
 0xef0   :  { %v1068_v5 = vmul.f32 0.03125, %v1064_v4 }
 0xef1   :  { %v1067_v6 = vpop.xlane.xlu0 %1066 }
 0xef2   :  { %v1070_v7 = vsub.f32 %v3610_v54, %v1068_v5  ;;  %v1069_v8 = vmul.f32 0.03125, %v1067_v6 }
 0xef4   :  { %v1071_v10 = vsub.f32 %v3613_v57, %v1069_v8  ;;  %v1072_v11 = vmul.f32 %v1070_v7, %v1070_v7 }
 0xef6   :  { %v1074_v12 = vsel %vm137_vm4, %v1072_v11, 0.0  ;;  %v1073_v13 = vmul.f32 %v1071_v10, %v1071_v10 }
 0xef7   :  { %1075 = vadd.xlane.f32.xlu0 %v1074_v12 }
 0xef8   :  { %v1077_v14 = vsel %vm137_vm4, %v1073_v13, 0.0 }
 0xefb   :  { %1078 = vadd.xlane.f32.xlu0 %v1077_v14 }
 0xf11   :  { %1088 = vrot.lane.b32.xlu0 %v3599_v39, %s3339_s16 }
 0xf15   :  { %1093 = vrot.lane.b32.xlu0 %v3599_v39, %s3344_s1 }
 0xf84   :  { %v1076_v25 = vpop.xlane.xlu0 %1075 }
 0xf85   :  { %v1080_v26 = vmul.f32 0.03125, %v1076_v25 }
 0xf87   :  { %v1082_v9 = vadd.f32 1e-05, %v1080_v26 }
 0xf88   :  { %v1079_v27 = vpop.xlane.xlu0 %1078 }
 0xf89   :  { %3263 = vrsqrt.f32 %v1082_v9  ;;  %v1081_v28 = vmul.f32 0.03125, %v1079_v27 }
 0xf8b   :  { %v1083_v29 = vadd.f32 1e-05, %v1081_v28 }
 0xf8c   :  { %v1089_v31 = vpop.permute.xlu0 %1088 }
 0xf8d   :  { %3265 = vrsqrt.f32 %v1083_v29 }
 0xf90   :  { %v1094_v35 = vpop.permute.xlu0 %1093 }
 0xf93   :  { %v3264_v30 = vpop.eup %3263 }
 0xf94   :  { %v1086_v32 = vmul.f32 %v3264_v30, %v1070_v7 }
 0xf96   :  { %v1091_v34 = vmul.f32 %v1089_v31, %v1086_v32 }
 0xf97   :  { %v3266_v33 = vpop.eup %3265 }
 0xf98   :  { %v1087_v16 = vmul.f32 %v3266_v33, %v1071_v10  ;;  %v1096_v37 = vadd.f32 %v1094_v35, %v1091_v34 }
 0xf9a   :  { %v1092_v36 = vmul.f32 %v1089_v31, %v1087_v16 }
 0xf9c   :  { %v1097_v39 = vadd.f32 %v1094_v35, %v1092_v36 }
 0xf9e   :  { %v1114_v40 = vpack.c.bf16 %v1097_v39, %v1096_v37 }
 0xfa0   :  { %3048 = vmatmul.mubr.msk.bf16.vlgmr.msra.gmra.mrb[24].mxu0 %vm137_vm4, %v1114_v40 }
 0xfa1   :  { %3077 = vmatprep.mubr.msk.f32.mxu0 %vm3337_vm0, %v3336_v2 }
0x1073   :  { %v1220_v44 = vpop.f32.mrb[24].mxu0 }
0x1074   :  { %v1221_v45 = vadd.f32 %v2769_v43, %v1220_v44  ;;  %v3049_v46 = vpop.f32.mrb[25].mxu0  ;;  %v2779_v44 = vld [vmem:[%s3991_s3 + $0xc] ss:$0 sm:$0xff] }
0x1075   :  { %v1223_v49 = vpop.f32.mrb[26].mxu0 }
0x1076   :  { %v1229_v51 = vmul.f32 0.70710677, %v1221_v45  ;;  %v1224_v52 = vadd.f32 %v2769_v43, %v1223_v49  ;;  %v3050_v53 = vpop.f32.mrb[27].mxu0  ;;  %v1227_v37 = vmul.f32 0.5, %v1221_v45 }
0x1078   :  { %v1231_v55 = vand.u32 2147483647, %v1229_v51  ;;  %v1230_v56 = vmul.f32 0.70710677, %v1224_v52  ;;  %vm1271_vm8 = vcmp.ge.f32.partialorder %v1229_v51, 0.0  ;;  %v1228_v39 = vmul.f32 0.5, %v1224_v52 }
0x107a   :  { %v1233_v38 = vmul.f32 0.3275911, %v1231_v55  ;;  %v1232_v58 = vand.u32 2147483647, %v1230_v56  ;;  %v1259_v60 = vmul.f32 %v1231_v55, %v1231_v55  ;;  %vm1272_vm9 = vcmp.ge.f32.partialorder %v1230_v56, 0.0 }
0x107c   :  { %v1235_v59 = vadd.f32 1.0, %v1233_v38  ;;  %v1234_v17 = vmul.f32 0.3275911, %v1232_v58  ;;  %v1260_v61 = vmul.f32 %v1232_v58, %v1232_v58  ;;  %v1261_v63 = vsub.f32 0.0, %v1259_v60 }
0x107e   :  { %3267 = vrcp.f32 %v1235_v59  ;;  %v1236_v20 = vadd.f32 1.0, %v1234_v17  ;;  %v1262_v4 = vsub.f32 0.0, %v1260_v61  ;;  %v1263_v5 = vmul.f32 1.442695, %v1261_v63  ;;  %v3217_v59 = vld [vmem:[%s3992_s4 + $0x30] sm:$0xff]  }
0x1080   :  { %3269 = vrcp.f32 %v1236_v20  ;;  %v1265_v11 = vmul.f32 1.442695, %v1262_v4  ;;  %v3219_v20 = vld [vmem:[%s3992_s4 + $0x40] sm:$0xff]  }
0x1081   :  { %3271 = vpow2.f32 %v1263_v5  ;;  %v1469_v60 = vsel %vm137_vm4, %v3219_v20, 0 }
0x1082   :  { %3273 = vpow2.f32 %v1265_v11  ;;  %v2782_v11 = vld [vmem:[%s3991_s3 + $0x1] ss:$0 sm:$0xff] }
0x1088   :  { %v3268_v62 = vpop.eup %3267 }
0x1089   :  { %v1241_v0 = vmul.f32 1.0614054, %v3268_v62 }
0x108a   :  { %v3270_v1 = vpop.eup %3269 }
0x108b   :  { %v1243_v3 = vadd.f32 -1.4531521, %v1241_v0  ;;  %v1242_v6 = vmul.f32 1.0614054, %v3270_v1  ;;  %v3272_v26 = vpop.eup %3271 }
0x108c   :  { %v3274_v29 = vpop.eup %3273 }
0x108d   :  { %v1245_v7 = vmul.f32 %v3268_v62, %v1243_v3  ;;  %v1244_v8 = vadd.f32 -1.4531521, %v1242_v6 }
0x108f   :  { %v1247_v10 = vadd.f32 1.4214138, %v1245_v7  ;;  %v1246_v12 = vmul.f32 %v3270_v1, %v1244_v8  ;;  %v3220_v8 = vld [vmem:[%s3992_s4 + $0x48] sm:$0xff]  }
0x1091   :  { %v1249_v13 = vmul.f32 %v3268_v62, %v1247_v10  ;;  %v1248_v14 = vadd.f32 1.4214138, %v1246_v12  ;;  %v1472_v10 = vsel %vm137_vm4, %v3220_v8, 0  ;;  %v3221_v12 = vld [vmem:[%s3992_s4 + $0x50] sm:$0xff]  }
0x1093   :  { %v1251_v15 = vadd.f32 -0.28449672, %v1249_v13  ;;  %v1250_v18 = vmul.f32 %v3270_v1, %v1248_v14  ;;  %v1475_v13 = vsel %vm137_vm4, %v3221_v12, 0  ;;  %v3222_v14 = vld [vmem:[%s3992_s4 + $0x58] sm:$0xff]  }
0x1095   :  { %v1253_v19 = vmul.f32 %v3268_v62, %v1251_v15  ;;  %v1252_v22 = vadd.f32 -0.28449672, %v1250_v18  ;;  %v1478_v15 = vsel %vm137_vm4, %v3222_v14, 0  ;;  %v1346_v18 = vld [vmem:[%s3991_s3 + $0x1] sm:$0x11] }
0x1097   :  { %v1255_v23 = vadd.f32 0.2548296, %v1253_v19  ;;  %v1254_v24 = vmul.f32 %v3270_v1, %v1252_v22  ;;  %v1406_v19 = vrot.slane %v1346_v18, %v3487_v48  ;;  %v1410_v22 = vrot.slane %v1346_v18, %v197_v50 }
0x1099   :  { %v1257_v25 = vmul.f32 %v3268_v62, %v1255_v23  ;;  %v1256_v9 = vadd.f32 0.2548296, %v1254_v24  ;;  %v1416_v23 = vrot.slane %v1406_v19, %v3487_v48  ;;  %v1420_v24 = vrot.slane %v1410_v22, %v3487_v48 }
0x109b   :  { %v1267_v27 = vmul.f32 %v3272_v26, %v1257_v25  ;;  %v1258_v28 = vmul.f32 %v3270_v1, %v1256_v9 }
0x109d   :  { %v1269_v30 = vsub.f32 1.0, %v1267_v27  ;;  %v1268_v31 = vmul.f32 %v3274_v29, %v1258_v28 }
0x109f   :  { %v1273_v32 = vsub.f32 0.0, %v1269_v30  ;;  %v1270_v33 = vsub.f32 1.0, %v1268_v31 }
0x10a1   :  { %v1275_v16 = vsel %vm1271_vm8, %v1269_v30, %v1273_v32  ;;  %v1274_v34 = vsub.f32 0.0, %v1270_v33 }
0x10a2   :  { %v1277_v35 = vadd.f32 1.0, %v1275_v16 }
0x10a3   :  { %v1276_v36 = vsel %vm1272_vm9, %v1270_v33, %v1274_v34 }
0x10a4   :  { %v1278_v40 = vadd.f32 1.0, %v1276_v36  ;;  %v1279_v41 = vmul.f32 %v1277_v35, %v1227_v37 }
0x10a6   :  { %v1280_v42 = vmul.f32 %v1278_v40, %v1228_v39 }
0x10a8   :  { %v1285_v43 = vpack.c.bf16 %v1280_v42, %v1279_v41 }
0x10aa   :  { %3056 = vmatmul.mubr.bf16.vlgmr.msra.gmra.mrb[4].mxu1 %v1285_v43 }
0x10ab   :  { %3071 = vmatprep.mubr.msk.bf16.mxu1 %vm3337_vm0, %v3336_v2 }
0x117d   :  { %v1336_v46 = vpop.f32.mrb[4].mxu1 }
0x117e   :  { %v1337_v49 = vadd.f32 %v2779_v44, %v1336_v46  ;;  %v3057_v51 = vpop.f32.mrb[5].mxu1 }
0x117f   :  { %v1339_v53 = vpop.f32.mrb[6].mxu1 }
0x1180   :  { %v3687_v55 = vadd.f32 %v1337_v49, %v3610_v54  ;;  %v1340_v45 = vadd.f32 %v2779_v44, %v1339_v53  ;;  %v3058_v52 = vpop.f32.mrb[7].mxu1  ;;  %v1463_v54 = vsel %vm137_vm4, %v3217_v59, 0 }
0x1181   :  { %3060 = vmatpush3.bf16.xpose.msra.mxu1 %v1463_v54 }
0x1182   :  { %v3690_v56 = vadd.f32 %v1340_v45, %v3613_v57  ;;  %v1350_v38 = vsel %vm137_vm4, %v3687_v55, 0.0  ;;  %3061 = vmatprep.subr.bf16.mxu1 %v3336_v2  ;;  %v3218_v57 = vld [vmem:[%s3992_s4 + $0x38] sm:$0xff]  }
0x1183   :  { %1351 = vadd.xlane.f32.xlu1 %v1350_v38  ;;  %v1466_v17 = vsel %vm137_vm4, %v3218_v57, 0 }
0x1184   :  { %v1353_v58 = vsel %vm137_vm4, %v3690_v56, 0.0 }
0x1185   :  { %1354 = vadd.xlane.f32.xlu0 %v1353_v58 }
0x1189   :  { %3062 = vmatpush3.bf16.xpose.msra.mxu1 %v1466_v17 }
0x118a   :  { %3063 = vmatprep.subr.bf16.mxu1 %v3336_v2 }
0x1191   :  { %3064 = vmatpush3.bf16.xpose.msra.mxu1 %v1469_v60 }
0x1192   :  { %3065 = vmatprep.subr.bf16.mxu1 %v3336_v2 }
0x1199   :  { %3066 = vmatpush3.bf16.xpose.msra.mxu1 %v1472_v10 }
0x119a   :  { %3067 = vmatprep.subr.bf16.mxu1 %v3336_v2 }
0x11a1   :  { %3068 = vmatpush3.bf16.xpose.msra.mxu1 %v1475_v13 }
0x11a2   :  { %3069 = vmatprep.subr.bf16.mxu1 %v3336_v2 }
0x11a9   :  { %3070 = vmatpush3.bf16.xpose.msra.mxu1 %v1478_v15 }
0x11aa   :  { %3095 = vmatprep.subr.mxu1 %v3336_v2 }
0x1210   :  { %v1352_v61 = vpop.xlane.xlu1 %1351 }
0x1211   :  { %v1356_v62 = vmul.f32 0.03125, %v1352_v61 }
0x1212   :  { %v1355_v63 = vpop.xlane.xlu0 %1354 }
0x1213   :  { %v1358_v0 = vsub.f32 %v3687_v55, %v1356_v62  ;;  %v1357_v1 = vmul.f32 0.03125, %v1355_v63 }
0x1215   :  { %v1359_v3 = vsub.f32 %v3690_v56, %v1357_v1  ;;  %v1360_v4 = vmul.f32 %v1358_v0, %v1358_v0 }
0x1217   :  { %v1362_v5 = vsel %vm137_vm4, %v1360_v4, 0.0  ;;  %v1361_v6 = vmul.f32 %v1359_v3, %v1359_v3 }
0x1218   :  { %1363 = vadd.xlane.f32.xlu1 %v1362_v5 }
0x1219   :  { %v1365_v7 = vsel %vm137_vm4, %v1361_v6, 0.0 }
0x121c   :  { %1366 = vadd.xlane.f32.xlu1 %v1365_v7 }
0x122d   :  { %1383 = vrot.lane.b32.xlu1 %v2782_v11, %s3338_s30 }
0x1231   :  { %1453 = vrot.lane.b32.xlu1 %v1416_v23, %s3339_s16 }
0x1235   :  { %1455 = vrot.lane.b32.xlu1 %v1420_v24, %s3339_s16 }
0x12a5   :  { %v1364_v25 = vpop.xlane.xlu1 %1363 }
0x12a6   :  { %v1368_v26 = vmul.f32 0.03125, %v1364_v25 }
0x12a8   :  { %v1370_v9 = vadd.f32 1e-05, %v1368_v26 }
0x12a9   :  { %v1367_v27 = vpop.xlane.xlu1 %1366 }
0x12aa   :  { %3275 = vrsqrt.f32 %v1370_v9  ;;  %v1369_v28 = vmul.f32 0.03125, %v1367_v27 }
0x12ac   :  { %v1371_v29 = vadd.f32 1e-05, %v1369_v28 }
0x12ad   :  { %v1384_v33 = vpop.permute.xlu1 %1383 }
0x12ae   :  { %3277 = vrsqrt.f32 %v1371_v29 }
0x12b1   :  { %v1454_v36 = vpop.permute.xlu1 %1453 }
0x12b4   :  { %v3276_v30 = vpop.eup %3275 }
0x12b5   :  { %v1374_v31 = vmul.f32 %v3276_v30, %v1358_v0  ;;  %v1456_v37 = vpop.permute.xlu1 %1455 }
0x12b6   :  { %v1457_v39 = vsel %vm81_vm3, %v1454_v36, %v1456_v37 }
0x12b7   :  { %v1380_v32 = vmul.f32 %v2782_v11, %v1374_v31 }
0x12b8   :  { %v3278_v47 = vpop.eup %3277 }
0x12b9   :  { %v1375_v50 = vmul.f32 %v3278_v47, %v1359_v3  ;;  %v1386_v34 = vadd.f32 %v1384_v33, %v1380_v32 }
0x12bb   :  { %v1381_v16 = vmul.f32 %v2782_v11, %v1375_v50 }
0x12bd   :  { %v1387_v35 = vadd.f32 %v1384_v33, %v1381_v16 }
0x12bf   :  { %v1401_v48 = vpack.c.bf16 %v1387_v35, %v1386_v34 }
0x12c1   :  { %3072 = vmatmul.mubr.msk.bf16.vlgmr.msra.gmra.mrb[8].mxu1 %vm137_vm4, %v1401_v48 }
0x12c2   :  { %3097 = vmatprep.mubr.msk.f32.mxu1 %vm3337_vm0, %v3336_v2 }
0x1394   :  { %v1514_v40 = vpop.f32.mrb[8].mxu1 }
0x1395   :  { %v3748_v41 = vadd.f32 %v1514_v40, %v1457_v39  ;;  %v3073_v42 = vpop.f32.mrb[9].mxu1 }
0x1396   :  { %v1517_v43 = vpop.f32.mrb[10].mxu1 }
0x1397   :  { %v3750_v44 = vadd.f32 %v1517_v43, %v1457_v39  ;;  %1522 = vrot.lane.b32.xlu0 %v3748_v41, %s3338_s30  ;;  %v3074_v46 = vpop.f32.mrb[11].mxu1 }
0x1409   :  { %v1523_v49 = vpop.permute.xlu0 %1522 }
0x140a   :  { %3076 = vmatpush3.xpose.msk.msra.mxu0 %vm312_vm5, %v1523_v49 }
0x140b   :  { %3080 = vmatprep.subr.mxu0 %v3336_v2 }
0x140d   :  { %3078 = vmatmul.mubr.msk.f32.vlgmr.msra.gmra.mrb[28].mxu0 %vm312_vm5, %v3748_v41 }
0x140e   :  { %3082 = vmatprep.mubr.msk.f32.mxu0 %vm3337_vm0, %v3336_v2 }
0x14e0   :  { %v1594_v51 = vpop.f32.mrb[28].mxu0 }
0x14e1   :  { %v1598_v53 = vmul.f32 0.25, %v1594_v51  ;;  %v3079_v45 = vpop.f32.mrb[29].mxu0 }
0x14e2   :  { %v3223_v45 = vld [vmem:[%s3993_s5 + $0x10] sm:$0xff]  }
0x14e3   :  { %v1599_v52 = vsel %vm3514_vm6, %v1598_v53, -1e+30 }
0x14e4   :  { %v1600_v38 = vsel %vm389_vm7, %v1599_v52, -inf }
0x14e5   :  { %1601 = vmax.xlane.f32.xlu1 %v1600_v38  ;;  %v3224_v38 = vld [vmem:[%s3993_s5 + $0x18] sm:$0xff]  }
0x14f6   :  { %1611 = vrot.lane.b32.xlu1 %v3748_v41, %s3339_s16 }
0x14fa   :  { %1687 = vrot.lane.b32.xlu1 %v3748_v41, %s3341_s18 }
0x14fe   :  { %1860 = vrot.lane.b32.xlu1 %v3750_v44, %s3338_s30 }
0x1502   :  { %2027 = vrot.lane.b32.xlu1 %v3750_v44, %s3340_s17 }
0x1506   :  { %2025 = vrot.lane.b32.xlu1 %v3750_v44, %s3341_s18 }
0x1572   :  { %v1602_v58 = vpop.xlane.xlu1 %1601 }
0x1573   :  { %v1603_v59 = vsub.f32 %v1599_v52, %v1602_v58  ;;  %v2225_v52 = vsel %vm137_vm4, %v3223_v45, 0  ;;  %v2228_v58 = vsel %vm137_vm4, %v3224_v38, 0 }
0x1575   :  { %v1604_v54 = vmul.f32 1.442695, %v1603_v59 }
0x1576   :  { %v1612_v57 = vpop.permute.xlu1 %1611 }
0x1577   :  { %3279 = vpow2.f32 %v1604_v54  ;;  %3081 = vmatpush3.msra.mxu0 %v1612_v57  ;;  %v3841_v57 = vld [vmem:[%s3991_s3 + $0x5] ss:$0 sm:$0xff] }
0x1578   :  { %3085 = vmatprep.subr.mxu0 %v3336_v2 }
0x157a   :  { %v1688_v17 = vpop.permute.xlu1 %1687 }
0x157e   :  { %v1861_v20 = vpop.permute.xlu1 %1860 }
0x157f   :  { %3096 = vmatpush3.xpose.msk.msra.mxu1 %vm312_vm5, %v1861_v20 }
0x1580   :  { %3105 = vmatprep.subr.mxu1 %v3336_v2 }
0x1581   :  { %v3280_v60 = vpop.eup %3279 }
0x1582   :  { %3098 = vmatmul.mubr.msk.f32.vlgmr.msra.gmra.mrb[12].mxu1 %vm312_vm5, %v3750_v44  ;;  %v2028_v61 = vpop.permute.xlu1 %2027  ;;  %v1606_v62 = vsel %vm389_vm7, %v3280_v60, 0.0 }
0x1583   :  { %1607 = vadd.xlane.f32.xlu0 %v1606_v62  ;;  %3106 = vmatpush3.xpose.msk.msra.mxu1 %vm312_vm5, %v2028_v61 }
0x1584   :  { %3107 = vmatprep.mubr.msk.f32.mxu1 %vm3337_vm0, %v3336_v2  ;;  %3115 = vmatprep.subr.bf16.mxu1 %v3336_v2 }
0x1586   :  { %v2026_v63 = vpop.permute.xlu1 %2025 }
0x1587   :  { %3108 = vmatmul.mubr.msk.f32.vlgmr.msra.gmra.mrb[14].mxu1 %vm312_vm5, %v2026_v63 }
0x1588   :  { %3119 = vmatprep.mubr.msk.bf16.mxu1 %vm3337_vm0, %v3336_v2  ;;  %3116 = vmatpush3.bf16.xpose.msra.mxu1 %v2225_v52 }
0x1589   :  { %3117 = vmatprep.subr.bf16.mxu1 %v3336_v2 }
0x1590   :  { %3118 = vmatpush3.bf16.xpose.msra.mxu1 %v2228_v58 }
0x1591   :  { %3143 = vmatprep.subr.bf16.mxu1 %v3336_v2 }
0x1599   :  { %1689 = vrot.lane.b32.xlu0 %v3748_v41, %s3340_s17 }
0x1610   :  { %v1608_v0 = vpop.xlane.xlu0 %1607 }
0x1611   :  { %3281 = vrcp.f32 %v1608_v0 }
0x1614   :  { %v1690_v4 = vpop.permute.xlu0 %1689 }
0x161b   :  { %v3282_v1 = vpop.eup %3281 }
0x161c   :  { %v1610_v3 = vmul.f32 %v3282_v1, %v3280_v60 }
0x161e   :  { %3083 = vmatmul.mubr.msk.f32.vlgmr.msra.gmra.mrb[30].mxu0 %vm389_vm7, %v1610_v3 }
0x161f   :  { %3086 = vmatpush3.xpose.msk.msra.mxu0 %vm312_vm5, %v1690_v4  ;;  %3087 = vmatprep.mubr.msk.f32.mxu0 %vm3337_vm0, %v3336_v2 }
0x1620   :  { %3090 = vmatprep.subr.mxu0 %v3336_v2 }
0x1622   :  { %3088 = vmatmul.mubr.msk.f32.vlgmr.msra.gmra.mrb[32].mxu0 %vm312_vm5, %v1688_v17 }
0x1623   :  { %3092 = vmatprep.mubr.msk.f32.mxu0 %vm3337_vm0, %v3336_v2 }
0x1655   :  { %v1932_v5 = vpop.f32.mrb[12].mxu1 }
0x1656   :  { %v1936_v6 = vmul.f32 0.25, %v1932_v5  ;;  %v3099_v7 = vpop.f32.mrb[13].mxu1 }
0x1658   :  { %v1937_v8 = vsel %vm3514_vm6, %v1936_v6, -1e+30 }
0x1659   :  { %v1938_v10 = vsel %vm389_vm7, %v1937_v8, -inf }
0x165a   :  { %1939 = vmax.xlane.f32.xlu0 %v1938_v10  ;;  %v2099_v11 = vpop.f32.mrb[14].mxu1 }
0x165b   :  { %v2103_v12 = vmul.f32 0.25, %v2099_v11  ;;  %v3109_v13 = vpop.f32.mrb[15].mxu1 }
0x165d   :  { %v2104_v14 = vsel %vm3514_vm6, %v2103_v12, -1e+30 }
0x165e   :  { %v2105_v15 = vsel %vm389_vm7, %v2104_v14, -inf }
0x165f   :  { %2106 = vmax.xlane.f32.xlu0 %v2105_v15 }
0x16e7   :  { %v1940_v18 = vpop.xlane.xlu0 %1939 }
0x16e8   :  { %v1941_v19 = vsub.f32 %v1937_v8, %v1940_v18 }
0x16ea   :  { %v1942_v22 = vmul.f32 1.442695, %v1941_v19 }
0x16ec   :  { %3283 = vpow2.f32 %v1942_v22  ;;  %v2107_v23 = vpop.xlane.xlu0 %2106 }
0x16ed   :  { %v2108_v24 = vsub.f32 %v2104_v14, %v2107_v23 }
0x16ef   :  { %v2109_v25 = vmul.f32 1.442695, %v2108_v24  ;;  %v3227_v24 = vld [vmem:[%s3994_s6 + $0x50] sm:$0xff]  }
0x16f1   :  { %3285 = vpow2.f32 %v2109_v25  ;;  %v3802_v26 = vpop.f32.mrb[30].mxu0  ;;  %v2381_v25 = vsel %vm137_vm4, %v3227_v24, 0 }
0x16f2   :  { %v3084_v9 = vpop.f32.mrb[31].mxu0 }
0x16f5   :  { %v1761_v27 = vpop.f32.mrb[32].mxu0 }
0x16f6   :  { %v3284_v28 = vpop.eup %3283  ;;  %v1765_v29 = vmul.f32 0.25, %v1761_v27  ;;  %v3089_v30 = vpop.f32.mrb[33].mxu0  ;;  %v3229_v27 = vld [vmem:[%s3994_s6 + $0x60] sm:$0xff]  }
0x16f7   :  { %v1944_v31 = vsel %vm389_vm7, %v3284_v28, 0.0 }
0x16f8   :  { %1945 = vadd.xlane.f32.xlu0 %v1944_v31  ;;  %v1766_v47 = vsel %vm3514_vm6, %v1765_v29, -1e+30 }
0x16f9   :  { %v1767_v50 = vsel %vm389_vm7, %v1766_v47, -inf }
0x16fa   :  { %1768 = vmax.xlane.f32.xlu1 %v1767_v50 }
0x16fb   :  { %v3286_v32 = vpop.eup %3285 }
0x16fc   :  { %v2111_v33 = vsel %vm389_vm7, %v3286_v32, 0.0 }
0x16fe   :  { %2112 = vadd.xlane.f32.xlu1 %v2111_v33 }
0x170e   :  { %1778 = vrot.lane.b32.xlu0 %v3748_v41, %s3342_s19 }
0x170f   :  { %1949 = vrot.lane.b32.xlu1 %v3750_v44, %s3339_s16 }
0x1785   :  { %v1946_v16 = vpop.xlane.xlu0 %1945 }
0x1787   :  { %v1769_v34 = vpop.xlane.xlu1 %1768 }
0x1788   :  { %v1770_v35 = vsub.f32 %v1766_v47, %v1769_v34 }
0x1789   :  { %v1779_v48 = vpop.permute.xlu0 %1778 }
0x178a   :  { %v1771_v36 = vmul.f32 1.442695, %v1770_v35  ;;  %3091 = vmatpush3.msra.mxu0 %v1779_v48  ;;  %v3230_v48 = vld [vmem:[%s3994_s6 + $0x68] sm:$0xff]  }
0x178b   :  { %3100 = vmatprep.subr.mxu0 %v3336_v2  ;;  %v2113_v39 = vpop.xlane.xlu1 %2112 }
0x178c   :  { %3287 = vpow2.f32 %v1771_v36  ;;  %v2390_v36 = vsel %vm137_vm4, %v3230_v48, 0 }
0x178f   :  { %v1950_v40 = vpop.permute.xlu1 %1949 }
0x1796   :  { %v3288_v21 = vpop.eup %3287 }
0x1797   :  { %v1773_v37 = vsel %vm389_vm7, %v3288_v21, 0.0 }
0x1798   :  { %1774 = vadd.xlane.f32.xlu1 %v1773_v37 }
0x17a9   :  { %2116 = vrot.lane.b32.xlu1 %v3750_v44, %s3342_s19 }
0x17ad   :  { %2218 = vrot.lane.b32.xlu1 %v3841_v57, %s3338_s30 }
0x1825   :  { %v1775_v41 = vpop.xlane.xlu1 %1774 }
0x1826   :  { %3289 = vrcp.f32 %v1775_v41 }
0x1827   :  { %3291 = vrcp.f32 %v1946_v16 }
0x1828   :  { %3293 = vrcp.f32 %v2113_v39  ;;  %v3232_v39 = vld [vmem:[%s3994_s6 + $0x78] sm:$0xff]  }
0x1829   :  { %v2117_v44 = vpop.permute.xlu1 %2116 }
0x182d   :  { %v2219_v6 = vpop.permute.xlu1 %2218 }
0x1830   :  { %v3290_v42 = vpop.eup %3289 }
0x1831   :  { %v1777_v43 = vmul.f32 %v3290_v42, %v3288_v21  ;;  %v3292_v46 = vpop.eup %3291  ;;  %v3231_v21 = vld [vmem:[%s3994_s6 + $0x70] sm:$0xff]  }
0x1832   :  { %v1948_v49 = vmul.f32 %v3292_v46, %v3284_v28  ;;  %v3294_v51 = vpop.eup %3293  ;;  %v2387_v28 = vsel %vm137_vm4, %v3229_v27, 0  ;;  %v2393_v37 = vsel %vm137_vm4, %v3231_v21, 0 }
0x1833   :  { %3093 = vmatmul.mubr.msk.f32.vlgmr.msra.gmra.mrb[34].mxu0 %vm389_vm7, %v1777_v43  ;;  %v2115_v53 = vmul.f32 %v3294_v51, %v3286_v32 }
0x1834   :  { %3101 = vmatpush3.msra.mxu0 %v1950_v40  ;;  %3102 = vmatprep.mubr.msk.f32.mxu0 %vm3337_vm0, %v3336_v2  ;;  %v2396_v40 = vsel %vm137_vm4, %v3232_v39, 0 }
0x1835   :  { %3110 = vmatprep.subr.mxu0 %v3336_v2 }
0x1837   :  { %3103 = vmatmul.mubr.msk.f32.vlgmr.msra.gmra.mrb[36].mxu0 %vm389_vm7, %v1948_v49 }
0x1838   :  { %3111 = vmatpush3.msra.mxu0 %v2117_v44  ;;  %3112 = vmatprep.mubr.msk.f32.mxu0 %vm3337_vm0, %v3336_v2 }
0x1839   :  { %3123 = vmatprep.subr.bf16.mxu0 %v3336_v2 }
0x183b   :  { %3113 = vmatmul.mubr.msk.f32.vlgmr.msra.gmra.mrb[38].mxu0 %vm389_vm7, %v2115_v53 }
0x183c   :  { %3139 = vmatprep.mubr.msk.bf16.mxu0 %vm3337_vm0, %v3336_v2 }
0x1906   :  { %v1850_v59 = vpop.f32.mrb[34].mxu0 }
0x1907   :  { %v3094_v54 = vpop.f32.mrb[35].mxu0 }
0x190a   :  { %v2021_v17 = vpop.f32.mrb[36].mxu0 }
0x190b   :  { %v3104_v20 = vpop.f32.mrb[37].mxu0 }
0x190e   :  { %v2188_v60 = vpop.f32.mrb[38].mxu0 }
0x190f   :  { %v3190_v61 = vpack.i.bf16 %v2188_v60, %v1850_v59  ;;  %v3114_v62 = vpop.f32.mrb[39].mxu0  ;;  %v3233_v60 = vld [vmem:[%s3995_s7 + $0x10] sm:$0xff]  }
0x1910   :  { %v2838_v62 = vld [vmem:[%s3991_s3 + $0x9] ss:$0 sm:$0xff] }
0x1911   :  { %3191 = vrot.lane.b32.xlu0 %v3190_v61, %s3343_s22  ;;  %v3234_v61 = vld [vmem:[%s3995_s7 + $0x18] sm:$0xff]  }
0x1983   :  { %v3192_v63 = vpop.permute.xlu0 %3191 }
0x1984   :  { %v3194_v0 = vunpack.i.h.bf16 %v3192_v63  ;;  %v3193_v1 = vunpack.i.l.bf16 %v3192_v63 }
0x1986   :  { %v2196_v3 = vsel %vm312_vm5, %v2021_v17, %v3194_v0  ;;  %v1858_v4 = vsel %vm312_vm5, %v3802_v26, %v3193_v1  ;;  %v3228_v26 = vld [vmem:[%s3994_s6 + $0x58] sm:$0xff]  }
0x1987   :  { %v2202_v5 = vpack.c.bf16 %v2196_v3, %v1858_v4  ;;  %v2384_v9 = vsel %vm137_vm4, %v3228_v26, 0 }
0x1989   :  { %3120 = vmatmul.mubr.msk.bf16.vlgmr.msra.gmra.mrb[16].mxu1 %vm137_vm4, %v2202_v5 }
0x198a   :  { %3147 = vmatprep.mubr.msk.bf16.mxu1 %vm3337_vm0, %v3336_v2  ;;  %3144 = vmatpush3.bf16.xpose.msra.mxu1 %v3233_v60 }
0x198b   :  { %3145 = vmatprep.subr.bf16.mxu1 %v3336_v2 }
0x1992   :  { %3146 = vmatpush3.bf16.xpose.msra.mxu1 %v3234_v61 }
0x1993   :  { %3151 = vmatprep.subr.bf16.mxu1 %v3336_v2 }
0x1a5c   :  { %v2264_v7 = vpop.f32.mrb[16].mxu1 }
0x1a5d   :  { %v2265_v8 = vadd.f32 %v2264_v7, %v2219_v6  ;;  %v3121_v10 = vpop.f32.mrb[17].mxu1 }
0x1a5e   :  { %v2267_v11 = vpop.f32.mrb[18].mxu1 }
0x1a5f   :  { %v3853_v12 = vadd.f32 %v2265_v8, %v3687_v55  ;;  %v2268_v13 = vadd.f32 %v2267_v11, %v2219_v6  ;;  %v3122_v14 = vpop.f32.mrb[19].mxu1  ;;  %v3225_v55 = vld [vmem:[%s3994_s6 + $0x40] sm:$0xff]  }
0x1a60   :  { %v2375_v22 = vsel %vm137_vm4, %v3225_v55, 0 }
0x1a61   :  { %v3856_v15 = vadd.f32 %v2268_v13, %v3690_v56  ;;  %v2273_v18 = vsel %vm137_vm4, %v3853_v12, 0.0  ;;  %3124 = vmatpush3.bf16.xpose.msra.mxu0 %v2375_v22  ;;  %v3226_v56 = vld [vmem:[%s3994_s6 + $0x48] sm:$0xff]  }
0x1a62   :  { %2274 = vadd.xlane.f32.xlu0 %v2273_v18  ;;  %3125 = vmatprep.subr.bf16.mxu0 %v3336_v2  ;;  %v2378_v23 = vsel %vm137_vm4, %v3226_v56, 0 }
0x1a63   :  { %v2276_v19 = vsel %vm137_vm4, %v3856_v15, 0.0 }
0x1a64   :  { %2277 = vadd.xlane.f32.xlu1 %v2276_v19 }
0x1a69   :  { %3126 = vmatpush3.bf16.xpose.msra.mxu0 %v2378_v23 }
0x1a6a   :  { %3127 = vmatprep.subr.bf16.mxu0 %v3336_v2 }
0x1a71   :  { %3128 = vmatpush3.bf16.xpose.msra.mxu0 %v2381_v25 }
0x1a72   :  { %3129 = vmatprep.subr.bf16.mxu0 %v3336_v2 }
0x1a75   :  { %2299 = vrot.lane.b32.xlu1 %v3841_v57, %s3339_s16 }
0x1a79   :  { %3130 = vmatpush3.bf16.xpose.msra.mxu0 %v2384_v9 }
0x1a7a   :  { %3131 = vmatprep.subr.bf16.mxu0 %v3336_v2 }
0x1a81   :  { %3132 = vmatpush3.bf16.xpose.msra.mxu0 %v2387_v28 }
0x1a82   :  { %3133 = vmatprep.subr.bf16.mxu0 %v3336_v2 }
0x1a89   :  { %3134 = vmatpush3.bf16.xpose.msra.mxu0 %v2390_v36 }
0x1a8a   :  { %3135 = vmatprep.subr.bf16.mxu0 %v3336_v2 }
0x1a91   :  { %3136 = vmatpush3.bf16.xpose.msra.mxu0 %v2393_v37 }
0x1a92   :  { %3137 = vmatprep.subr.bf16.mxu0 %v3336_v2 }
0x1a99   :  { %3138 = vmatpush3.bf16.xpose.msra.mxu0 %v2396_v40 }
0x1aef   :  { %v2275_v29 = vpop.xlane.xlu0 %2274 }
0x1af0   :  { %v2279_v30 = vmul.f32 0.03125, %v2275_v29 }
0x1af1   :  { %v2278_v31 = vpop.xlane.xlu1 %2277 }
0x1af2   :  { %v2281_v47 = vsub.f32 %v3853_v12, %v2279_v30  ;;  %v2280_v50 = vmul.f32 0.03125, %v2278_v31 }
0x1af4   :  { %v2282_v32 = vsub.f32 %v3856_v15, %v2280_v50  ;;  %v2283_v33 = vmul.f32 %v2281_v47, %v2281_v47 }
0x1af5   :  { %v2300_v45 = vpop.permute.xlu1 %2299 }
0x1af6   :  { %v2285_v16 = vsel %vm137_vm4, %v2283_v33, 0.0  ;;  %v2284_v34 = vmul.f32 %v2282_v32, %v2282_v32 }
0x1af7   :  { %2286 = vadd.xlane.f32.xlu0 %v2285_v16 }
0x1af8   :  { %v2288_v35 = vsel %vm137_vm4, %v2284_v34, 0.0 }
0x1afb   :  { %2289 = vadd.xlane.f32.xlu0 %v2288_v35 }
0x1b11   :  { %2304 = vrot.lane.b32.xlu0 %v3841_v57, %s3344_s1 }
0x1b84   :  { %v2287_v41 = vpop.xlane.xlu0 %2286 }
0x1b85   :  { %v2291_v42 = vmul.f32 0.03125, %v2287_v41 }
0x1b87   :  { %v2293_v43 = vadd.f32 1e-05, %v2291_v42 }
0x1b88   :  { %v2290_v46 = vpop.xlane.xlu0 %2289 }
0x1b89   :  { %3295 = vrsqrt.f32 %v2293_v43  ;;  %v2292_v49 = vmul.f32 0.03125, %v2290_v46 }
0x1b8b   :  { %v2294_v51 = vadd.f32 1e-05, %v2292_v49 }
0x1b8c   :  { %v2305_v59 = vpop.permute.xlu0 %2304 }
0x1b8d   :  { %3297 = vrsqrt.f32 %v2294_v51 }
0x1b93   :  { %v3296_v44 = vpop.eup %3295 }
0x1b94   :  { %v2297_v53 = vmul.f32 %v3296_v44, %v2281_v47 }
0x1b96   :  { %v2302_v58 = vmul.f32 %v2300_v45, %v2297_v53 }
0x1b97   :  { %v3298_v52 = vpop.eup %3297 }
0x1b98   :  { %v2298_v38 = vmul.f32 %v3298_v52, %v2282_v32  ;;  %v2307_v57 = vadd.f32 %v2305_v59, %v2302_v58 }
0x1b9a   :  { %v2303_v54 = vmul.f32 %v2300_v45, %v2298_v38 }
0x1b9c   :  { %v2308_v17 = vadd.f32 %v2305_v59, %v2303_v54 }
0x1b9e   :  { %v2326_v20 = vpack.c.bf16 %v2308_v17, %v2307_v57 }
0x1ba0   :  { %3140 = vmatmul.mubr.msk.bf16.vlgmr.msra.gmra.mrb[40].mxu0 %vm137_vm4, %v2326_v20  ;;  %v2852_v20 = vld [vmem:[%s3991_s3 + $0xd] ss:$0 sm:$0xff] }
0x1c73   :  { %v2432_v63 = vpop.f32.mrb[40].mxu0 }
0x1c74   :  { %v2433_v0 = vadd.f32 %v2838_v62, %v2432_v63  ;;  %v3141_v1 = vpop.f32.mrb[41].mxu0 }
0x1c75   :  { %v2435_v3 = vpop.f32.mrb[42].mxu0 }
0x1c76   :  { %v2441_v4 = vmul.f32 0.70710677, %v2433_v0  ;;  %v2436_v5 = vadd.f32 %v2838_v62, %v2435_v3  ;;  %v3142_v6 = vpop.f32.mrb[43].mxu0  ;;  %v2439_v38 = vmul.f32 0.5, %v2433_v0 }
0x1c78   :  { %v2443_v7 = vand.u32 2147483647, %v2441_v4  ;;  %v2442_v8 = vmul.f32 0.70710677, %v2436_v5  ;;  %vm2483_vm10 = vcmp.ge.f32.partialorder %v2441_v4, 0.0  ;;  %v2440_v58 = vmul.f32 0.5, %v2436_v5 }
0x1c7a   :  { %v2445_v10 = vmul.f32 0.3275911, %v2443_v7  ;;  %v2444_v11 = vand.u32 2147483647, %v2442_v8  ;;  %v2471_v19 = vmul.f32 %v2443_v7, %v2443_v7  ;;  %vm2484_vm11 = vcmp.ge.f32.partialorder %v2442_v8, 0.0  ;;  %v3235_v7 = vld [vmem:[%s3996_s8] sm:$0xff]  }
0x1c7b   :  { %v2658_v8 = vsel %vm137_vm4, %v3235_v7, 0 }
0x1c7c   :  { %v2447_v13 = vadd.f32 1.0, %v2445_v10  ;;  %v2446_v14 = vmul.f32 0.3275911, %v2444_v11  ;;  %v2472_v55 = vmul.f32 %v2444_v11, %v2444_v11  ;;  %v2473_v56 = vsub.f32 0.0, %v2471_v19 }
0x1c7e   :  { %3299 = vrcp.f32 %v2447_v13  ;;  %v2448_v18 = vadd.f32 1.0, %v2446_v14  ;;  %v2474_v26 = vsub.f32 0.0, %v2472_v55  ;;  %v2475_v9 = vmul.f32 1.442695, %v2473_v56  ;;  %v3238_v13 = vld [vmem:[%s3996_s8 + $0x18] sm:$0xff]  }
0x1c7f   :  { %v2667_v14 = vsel %vm137_vm4, %v3238_v13, 0 }
0x1c80   :  { %3301 = vrcp.f32 %v2448_v18  ;;  %v2477_v31 = vmul.f32 1.442695, %v2474_v26  ;;  %v3239_v18 = vld [vmem:[%s3996_s8 + $0x20] sm:$0xff]  }
0x1c81   :  { %3303 = vpow2.f32 %v2475_v9  ;;  %v2670_v19 = vsel %vm137_vm4, %v3239_v18, 0 }
0x1c82   :  { %3305 = vpow2.f32 %v2477_v31 }
0x1c88   :  { %v3300_v22 = vpop.eup %3299 }
0x1c89   :  { %v2453_v23 = vmul.f32 1.0614054, %v3300_v22 }
0x1c8a   :  { %v3302_v24 = vpop.eup %3301 }
0x1c8b   :  { %v2455_v25 = vadd.f32 -1.4531521, %v2453_v23  ;;  %v2454_v27 = vmul.f32 1.0614054, %v3302_v24  ;;  %v3304_v37 = vpop.eup %3303 }
0x1c8c   :  { %v3306_v42 = vpop.eup %3305 }
0x1c8d   :  { %v2457_v28 = vmul.f32 %v3300_v22, %v2455_v25  ;;  %v2456_v29 = vadd.f32 -1.4531521, %v2454_v27 }
0x1c8f   :  { %v2459_v30 = vadd.f32 1.4214138, %v2457_v28  ;;  %v2458_v47 = vmul.f32 %v3302_v24, %v2456_v29  ;;  %v3240_v29 = vld [vmem:[%s3996_s8 + $0x28] sm:$0xff]  }
0x1c90   :  { %v2673_v31 = vsel %vm137_vm4, %v3240_v29, 0 }
0x1c91   :  { %v2461_v50 = vmul.f32 %v3300_v22, %v2459_v30  ;;  %v2460_v32 = vadd.f32 1.4214138, %v2458_v47  ;;  %v2855_v30 = vld [vmem:[%s3991_s3 + $0x2] ss:$0 sm:$0xff]  ;;  %v3241_v47 = vld [vmem:[%s3996_s8 + $0x30] sm:$0xff]   ;;  %s3345_s3 = smov [#allocation2]  }
0x1c93   :  { %v2463_v33 = vadd.f32 -0.28449672, %v2461_v50  ;;  %v2462_v16 = vmul.f32 %v3302_v24, %v2460_v32  ;;  %v2676_v50 = vsel %vm137_vm4, %v3241_v47, 0  ;;  %v3242_v32 = vld [vmem:[%s3996_s8 + $0x38] sm:$0xff]  }
0x1c95   :  { %v2465_v34 = vmul.f32 %v3300_v22, %v2463_v33  ;;  %v2464_v35 = vadd.f32 -0.28449672, %v2462_v16  ;;  %v2679_v33 = vsel %vm137_vm4, %v3242_v32, 0 }
0x1c97   :  { %v2467_v48 = vadd.f32 0.2548296, %v2465_v34  ;;  %v2466_v36 = vmul.f32 %v3302_v24, %v2464_v35 }
0x1c99   :  { %v2469_v21 = vmul.f32 %v3300_v22, %v2467_v48  ;;  %v2468_v39 = vadd.f32 0.2548296, %v2466_v36 }
0x1c9b   :  { %v2479_v40 = vmul.f32 %v3304_v37, %v2469_v21  ;;  %v2470_v41 = vmul.f32 %v3302_v24, %v2468_v39 }
0x1c9d   :  { %v2481_v43 = vsub.f32 1.0, %v2479_v40  ;;  %v2480_v46 = vmul.f32 %v3306_v42, %v2470_v41 }
0x1c9f   :  { %v2485_v49 = vsub.f32 0.0, %v2481_v43  ;;  %v2482_v51 = vsub.f32 1.0, %v2480_v46 }
0x1ca1   :  { %v2487_v44 = vsel %vm2483_vm10, %v2481_v43, %v2485_v49  ;;  %v2486_v53 = vsub.f32 0.0, %v2482_v51 }
0x1ca2   :  { %v2489_v45 = vadd.f32 1.0, %v2487_v44 }
0x1ca3   :  { %v2488_v52 = vsel %vm2484_vm11, %v2482_v51, %v2486_v53 }
0x1ca4   :  { %v2490_v59 = vadd.f32 1.0, %v2488_v52  ;;  %v2491_v54 = vmul.f32 %v2489_v45, %v2439_v38 }
0x1ca6   :  { %v2492_v57 = vmul.f32 %v2490_v59, %v2440_v58 }
0x1ca8   :  { %v2498_v17 = vpack.c.bf16 %v2492_v57, %v2491_v54 }
0x1caa   :  { %3148 = vmatmul.mubr.bf16.vlgmr.msra.gmra.mrb[20].mxu1 %v2498_v17 }
0x1cab   :  { %3167 = vmatprep.mubr.msk.bf16.mxu1 %vm3337_vm0, %v3336_v2  ;;  %3152 = vmatpush3.bf16.xpose.msra.mxu1 %v2658_v8 }
0x1cac   :  { %3153 = vmatprep.subr.bf16.mxu1 %v3336_v2 }
0x1d7d   :  { %v2549_v60 = vpop.f32.mrb[20].mxu1 }
0x1d7e   :  { %v2550_v61 = vadd.f32 %v2852_v20, %v2549_v60  ;;  %v3149_v62 = vpop.f32.mrb[21].mxu1 }
0x1d7f   :  { %v2552_v63 = vpop.f32.mrb[22].mxu1 }
0x1d80   :  { %v2553_v1 = vadd.f32 %v2852_v20, %v2552_v63  ;;  %v3150_v3 = vpop.f32.mrb[23].mxu1  ;;  %v2556_v0 = vadd.f32 %v2550_v61, %v3853_v12  ;;  %v3236_v12 = vld [vmem:[%s3996_s8 + $0x8] sm:$0xff]  }
0x1d81   :  { %v2661_v10 = vsel %vm137_vm4, %v3236_v12, 0 }
0x1d82   :  { %v2559_v4 = vsel %vm137_vm4, %v2556_v0, 0.0  ;;  %v2557_v5 = vadd.f32 %v2553_v1, %v3856_v15  ;;  %3154 = vmatpush3.bf16.xpose.msra.mxu1 %v2661_v10  ;;  %v3237_v15 = vld [vmem:[%s3996_s8 + $0x10] sm:$0xff]   ;;  %s2729_s8 = sshll.u32 %s3345_s3, 4  ;;  %s2730_s8 = int_to_ptr.vmem [resolvable:$true] %s2729_s8 }
0x1d83   :  { %2560 = vadd.xlane.f32.xlu1 %v2559_v4  ;;  %3155 = vmatprep.subr.bf16.mxu1 %v3336_v2  ;;  %v2664_v11 = vsel %vm137_vm4, %v3237_v15, 0  ;;  %p3316_p1 = scmp.lt.s32.totalorder %s2730_s8, %s2730_s8 }
0x1d84   :  { %v2562_v6 = vsel %vm137_vm4, %v2557_v5, 0.0 }
0x1d85   :  { %2563 = vadd.xlane.f32.xlu0 %v2562_v6 }
0x1d8a   :  { %3156 = vmatpush3.bf16.xpose.msra.mxu1 %v2664_v11 }
0x1d8b   :  { %3157 = vmatprep.subr.bf16.mxu1 %v3336_v2 }
0x1d92   :  { %3158 = vmatpush3.bf16.xpose.msra.mxu1 %v2667_v14 }
0x1d93   :  { %3159 = vmatprep.subr.bf16.mxu1 %v3336_v2 }
0x1d9a   :  { %3160 = vmatpush3.bf16.xpose.msra.mxu1 %v2670_v19 }
0x1d9b   :  { %3161 = vmatprep.subr.bf16.mxu1 %v3336_v2 }
0x1da2   :  { %3162 = vmatpush3.bf16.xpose.msra.mxu1 %v2673_v31 }
0x1da3   :  { %3163 = vmatprep.subr.bf16.mxu1 %v3336_v2 }
0x1daa   :  { %3164 = vmatpush3.bf16.xpose.msra.mxu1 %v2676_v50 }
0x1dab   :  { %3165 = vmatprep.subr.bf16.mxu1 %v3336_v2 }
0x1db2   :  { %3166 = vmatpush3.bf16.xpose.msra.mxu1 %v2679_v33 }
0x1e10   :  { %v2561_v55 = vpop.xlane.xlu1 %2560 }
0x1e11   :  { %v2565_v22 = vmul.f32 0.03125, %v2561_v55 }
0x1e12   :  { %v2564_v56 = vpop.xlane.xlu0 %2563 }
0x1e13   :  { %v2567_v23 = vsub.f32 %v2556_v0, %v2565_v22  ;;  %v2566_v24 = vmul.f32 0.03125, %v2564_v56 }
0x1e15   :  { %v2568_v25 = vsub.f32 %v2557_v5, %v2566_v24  ;;  %v2569_v26 = vmul.f32 %v2567_v23, %v2567_v23 }
0x1e17   :  { %v2571_v9 = vsel %vm137_vm4, %v2569_v26, 0.0  ;;  %v2570_v27 = vmul.f32 %v2568_v25, %v2568_v25 }
0x1e18   :  { %2572 = vadd.xlane.f32.xlu1 %v2571_v9 }
0x1e19   :  { %v2574_v28 = vsel %vm137_vm4, %v2570_v27, 0.0 }
0x1e1a   :  { %2575 = vadd.xlane.f32.xlu0 %v2574_v28 }
0x1e29   :  { %2592 = vrot.lane.b32.xlu1 %v2855_v30, %s3338_s30  ;;  %s3311_s30 = scalar_lea.vmem %s2730_s8, 256 }
0x1e2a   :  { %p3312_p0 = scmp.ne.s32.totalorder %s2730_s8, %s3311_s30  ;;  %p3317_p2 = scmp.lt.s32.totalorder %s3311_s30, %s3311_s30 }
0x1e2c   :  { %p3318_p3 = por %p3317_p2, %p3316_p1 }
0x1e2e   :  { %p3319_p4 = pnand %p3318_p3, %p3312_p0 }
0x1ea5   :  { %v2573_v16 = vpop.xlane.xlu1 %2572 }
0x1ea6   :  { %v2577_v34 = vmul.f32 0.03125, %v2573_v16 }
0x1ea7   :  { %v2576_v35 = vpop.xlane.xlu0 %2575 }
0x1ea8   :  { %v2579_v48 = vadd.f32 1e-05, %v2577_v34  ;;  %v2578_v36 = vmul.f32 0.03125, %v2576_v35 }
0x1ea9   :  { %v2593_v42 = vpop.permute.xlu1 %2592 }
0x1eaa   :  { %3307 = vrsqrt.f32 %v2579_v48  ;;  %v2580_v21 = vadd.f32 1e-05, %v2578_v36 }
0x1eac   :  { %3309 = vrsqrt.f32 %v2580_v21 }
0x1eb4   :  { %v3308_v37 = vpop.eup %3307 }
0x1eb5   :  { %v2583_v39 = vmul.f32 %v3308_v37, %v2567_v23 }
0x1eb6   :  { %v3310_v40 = vpop.eup %3309 }
0x1eb7   :  { %v2589_v41 = vmul.f32 %v2855_v30, %v2583_v39  ;;  %v2584_v2 = vmul.f32 %v3310_v40, %v2568_v25 }
0x1eb9   :  { %v2590_v43 = vmul.f32 %v2855_v30, %v2584_v2  ;;  %v2595_v46 = vadd.f32 %v2593_v42, %v2589_v41 }
0x1ebb   :  { %v2596_v49 = vadd.f32 %v2593_v42, %v2590_v43 }
0x1ebd   :  { %v2613_v51 = vpack.c.bf16 %v2596_v49, %v2595_v46 }
0x1ebf   :  { %3168 = vmatmul.mubr.msk.bf16.vlgmr.msra.gmra.mrb[24].mxu1 %vm137_vm4, %v2613_v51 }
0x1f92   :  { %v2715_v44 = vpop.f32.mrb[24].mxu1 }
0x1f93   :  { %2722 = vst [vmem:[#allocation2] sm:$0xff] %v2715_v44  ;;  %v3169_v53 = vpop.f32.mrb[25].mxu1 }
0x1f94   :  { %v2718_v45 = vpop.f32.mrb[26].mxu1 }
0x1f95   :  { %2723 = vst [vmem:[#allocation2 + $0x8] sm:$0xff] %v2718_v45  ;;  %v3170_v52 = vpop.f32.mrb[27].mxu1 }
0x1f96   :  { %3322 = shalt.err (!%p3319_p4)
}
0x1f97   :  { %s3323_s1 = scalar_lea.hbm %s3997_s9, 256 }
0x1f98   :  { %p3324_p5 = scmp.ne.s32.totalorder %s3997_s9, %s3323_s1  ;;  %p3327_p6 = scmp.lt.u32.totalorder %s3323_s1, %s3997_s9 }
0x1f9a   :  { %p3329_p7 = pnand %p3327_p6, %p3324_p5 }
0x1f9c   :  { %3332 = shalt.err (!%p3329_p7)
}
0x1f9d   :  { %s3346_s7 = smov 128   ;;  %s3347_s18 = smov 8  }
0x1f9e   :  { %2735 = dma.vmem_to_hbm [thread:$0]  %s2730_s8, 256, %s3997_s9, [#allocation3], %s3346_s7, %s3346_s7, %s3347_s18  }
0x1f9f   :  { %3333 = dma.done.wait [#allocation3], 256  }
0x1fa0   :  { %3334 = vsyncadd [#allocation3], 4294967040 }
0x1fa1   :  { %2739 = vsyncpa [#allocation3], 1 }

</bundles_post_ra>
